<compile_context>
chip_gen: v6e
topology: v6e:2x2x1
jax: 0.10.0
libtpu: 0.0.40
codegen_flags: <defaults>
</compile_context>

<pallas_src>
import functools
import math

import jax
import jax.numpy as jnp
from jax import lax
from jax.experimental import pallas as pl
from jax.experimental.pallas import tpu as pltpu


def _make_divisible(v, divisor, min_value=None):
    if min_value is None:
        min_value = divisor
    new_v = max(min_value, int(v + divisor / 2) // divisor * divisor)
    if new_v < 0.9 * v:
        new_v += divisor
    return new_v


def _relu6(x):
    return jnp.minimum(jnp.maximum(x, 0.0), 6.0)


def sgblock_kernel(x_ref, dw1_ref, pw_ref, dw2_ref, o_ref, *, H, W):
    """One batch element per grid step, NCHW with spatial dims flattened.

    x_ref  : (1, C, H*W)   input slab  (channels on sublanes, pixels on lanes)
    dw1_ref: (3, 3, C, 1)  depthwise 3x3 weights (groups = inp)
    pw_ref : (Co, C)       folded 1x1 pair: pw2 @ pw1
    dw2_ref: (3, 3, Co, 1) depthwise 3x3 weights (groups = oup)
    o_ref  : (1, Co, H*W)  output slab
    """
    HW = x_ref.shape[2]

    x = x_ref[0]                                    # (C, HW) float32

    # Hoisted W-boundary masks, shared by both depthwise convs.  The H boundary
    # needs no mask because the shifted views below are zero-filled at the ends
    # of the flattened spatial axis.
    w_idx = lax.broadcasted_iota(jnp.int32, (1, HW), 1) % W
    w_ok = {-1: w_idx >= 1, 1: w_idx <= W - 2}

    def shift_spatial(t, s):
        # u[:, p] = t[:, p + s] if 0 <= p + s < HW else 0   (in-register, no scratch)
        if s == 0:
            return t
        zeros = jnp.zeros((t.shape[0], abs(s)), t.dtype)
        if s > 0:
            return jnp.concatenate([t[:, s:], zeros], axis=1)
        return jnp.concatenate([zeros, t[:, :s]], axis=1)

    def dwconv3x3(t, w_ref):
        # Depthwise 3x3, stride 1, pad 1, on a (ch, HW) slab.
        acc = jnp.zeros(t.shape, jnp.float32)
        for kh in range(3):
            dh = kh - 1
            for kw in range(3):
                dw = kw - 1
                tap = shift_spatial(t, dh * W + dw)
                if dw != 0:
                    tap = jnp.where(w_ok[dw], tap, 0.0)
                acc = acc + tap * w_ref[kh, kw]     # (ch, 1) weight, lane-broadcast
        return acc

    t = _relu6(dwconv3x3(x, dw1_ref))               # dw3x3(groups=inp) + ReLU6
    u = jnp.dot(pw_ref[...], t,                     # folded 1x1 (inp->hidden->oup)
                preferred_element_type=jnp.float32)
    u = _relu6(u)                                   # ReLU6 after second 1x1
    v = dwconv3x3(u, dw2_ref)                       # dw3x3(groups=oup), stride 1
    o_ref[0] = v + x                                # identity residual (div == 1)


def sgblock_forward_nchw(x_nchw, dw1_w, pw1_w, pw2_w, dw2_w):
    """PyTorch-facing wrapper: NCHW input/output, PyTorch weight layouts.

    dw1_w: (inp, 1, 3, 3)       pw1_w: (hidden, inp, 1, 1)
    pw2_w: (oup, hidden, 1, 1)  dw2_w: (oup, 1, 3, 3)
    """
    N, C, H, W = x_nchw.shape
    Co = pw2_w.shape[0]
    HW = H * W

    # Host-side weight prep (tiny): depthwise weights -> (3, 3, ch, 1) so the
    # kernel can broadcast them over the lane (pixel) axis; the two 1x1 convs
    # fold into one (Co, C) matrix because there is no nonlinearity between them.
    dw1_k = jnp.transpose(dw1_w, (2, 3, 0, 1))                  # (3, 3, C, 1)
    dw2_k = jnp.transpose(dw2_w, (2, 3, 0, 1))                  # (3, 3, Co, 1)
    pw_k = pw2_w[:, :, 0, 0] @ pw1_w[:, :, 0, 0]                # (Co, C)

    x_flat = x_nchw.reshape(N, C, HW)                           # contiguous: free

    out_flat = pl.pallas_call(
        functools.partial(sgblock_kernel, H=H, W=W),
        out_shape=jax.ShapeDtypeStruct((N, Co, HW), jnp.float32),
        grid_spec=pltpu.PrefetchScalarGridSpec(
            num_scalar_prefetch=0,
            grid=(N,),
            in_specs=[
                pl.BlockSpec((1, C, HW), lambda b: (b, 0, 0)),
                pl.BlockSpec((3, 3, C, 1), lambda b: (0, 0, 0, 0)),
                pl.BlockSpec((Co, C), lambda b: (0, 0)),
                pl.BlockSpec((3, 3, Co, 1), lambda b: (0, 0, 0, 0)),
            ],
            out_specs=pl.BlockSpec((1, Co, HW), lambda b: (b, 0, 0)),
        ),
        compiler_params=pltpu.CompilerParams(
            dimension_semantics=("parallel",)),
    )(x_flat, dw1_k, pw_k, dw2_k)
    return out_flat.reshape(N, Co, H, W)


def sgblock_reference_nchw(x, dw1_w, pw1_w, pw2_w, dw2_w):
    # Pure-JAX reference (verification only), PyTorch layouts / NCHW.
    C = x.shape[1]
    Co = pw2_w.shape[0]
    dn = ("NCHW", "OIHW", "NCHW")

    def conv(y, w, pad, groups=1):
        return lax.conv_general_dilated(
            y, w, window_strides=(1, 1), padding=((pad, pad), (pad, pad)),
            dimension_numbers=dn, feature_group_count=groups,
            precision=lax.Precision.HIGHEST)

    t = _relu6(conv(x, dw1_w, pad=1, groups=C))
    t = conv(t, pw1_w, pad=0)
    t = _relu6(conv(t, pw2_w, pad=0))
    t = conv(t, dw2_w, pad=1, groups=Co)
    return t + x                                    # identity branch, div == 1


if __name__ == "__main__":
    # SGBlock constructor config (identity branch).
    inp, oup, stride, expand_ratio = 32, 32, 1, 4
    hidden_dim = inp // expand_ratio
    if hidden_dim < oup / 6.0:
        hidden_dim = _make_divisible(math.ceil(oup / 6.0), 16)

    N, H, W = 2, 16, 16

    key = jax.random.PRNGKey(0)
    kx, k1, k2, k3, k4 = jax.random.split(key, 5)

    # Input and weights in PyTorch conventions (NCHW / OIHW), deterministic.
    x = jax.random.normal(kx, (N, inp, H, W), dtype=jnp.float32)
    dw1_w = 0.2 * jax.random.normal(k1, (inp, 1, 3, 3), dtype=jnp.float32)
    pw1_w = 0.2 * jax.random.normal(k2, (hidden_dim, inp, 1, 1), dtype=jnp.float32)
    pw2_w = 0.2 * jax.random.normal(k3, (oup, hidden_dim, 1, 1), dtype=jnp.float32)
    dw2_w = 0.2 * jax.random.normal(k4, (oup, 1, 3, 3), dtype=jnp.float32)

    out = sgblock_forward_nchw(x, dw1_w, pw1_w, pw2_w, dw2_w)
    out = jax.block_until_ready(out)
    assert out.shape == (N, oup, H, W)

    ref = sgblock_reference_nchw(x, dw1_w, pw1_w, pw2_w, dw2_w)
    err = float(jnp.max(jnp.abs(out - ref)))
    assert jnp.allclose(out, ref, atol=2e-4, rtol=2e-4), f"mismatch vs reference: {err}"

    print("KERNEL_OK")
</pallas_src>

<mosaic_0001>
module attributes {stable_mosaic.version = 11 : i64} {
  func.func @sgblock_kernel(%arg0: i32, %arg1: memref<1x32x256xf32, #tpu.memory_space<vmem>>, %arg2: memref<3x3x32x1xf32, #tpu.memory_space<vmem>>, %arg3: memref<32x32xf32, #tpu.memory_space<vmem>>, %arg4: memref<3x3x32x1xf32, #tpu.memory_space<vmem>>, %arg5: memref<1x32x256xf32, #tpu.memory_space<vmem>>) attributes {dimension_semantics = [#tpu.dimension_semantics<parallel>], iteration_bounds = array<i64: 2>, scalar_prefetch = 0 : i64, scratch_operands = 0 : i64, tpu.core_type = #tpu.core_type<tc>, window_params = [{transform_indices = @transform_0, window_bounds = array<i64: 1, 32, 256>}, {pipeline_mode = #tpu.pipeline_mode<synchronous>, transform_indices = @transform_1, window_bounds = array<i64: 3, 3, 32, 1>}, {pipeline_mode = #tpu.pipeline_mode<synchronous>, transform_indices = @transform_2, window_bounds = array<i64: 32, 32>}, {pipeline_mode = #tpu.pipeline_mode<synchronous>, transform_indices = @transform_3, window_bounds = array<i64: 3, 3, 32, 1>}, {transform_indices = @transform_4, window_bounds = array<i64: 1, 32, 256>}]} {
    %c0 = arith.constant 0 : index
    %c0_0 = arith.constant 0 : index
    %c0_1 = arith.constant 0 : index
    %0 = vector.load %arg1[%c0, %c0_0, %c0_1] : memref<1x32x256xf32, #tpu.memory_space<vmem>>, vector<1x32x256xf32>
    %1 = vector.shape_cast %0 : vector<1x32x256xf32> to vector<32x256xf32>
    %2 = tpu.iota {dimensions = array<i32: 1>} : vector<1x256xi32>
    %c16_i32 = arith.constant 16 : i32
    %c0_i32 = arith.constant 0 : i32
    %3 = arith.cmpi eq, %c16_i32, %c0_i32 : i32
    %c1_i32 = arith.constant 1 : i32
    %4 = arith.select %3, %c1_i32, %c16_i32 : i32
    %5 = vector.broadcast %4 : i32 to vector<1x256xi32>
    %6 = arith.remsi %2, %5 : vector<1x256xi32>
    %c0_i32_2 = arith.constant 0 : i32
    %7 = vector.broadcast %c0_i32_2 : i32 to vector<1x256xi32>
    %8 = arith.cmpi ne, %6, %7 : vector<1x256xi32>
    %c0_i32_3 = arith.constant 0 : i32
    %9 = vector.broadcast %c0_i32_3 : i32 to vector<1x256xi32>
    %10 = arith.cmpi slt, %6, %9 : vector<1x256xi32>
    %c0_i32_4 = arith.constant 0 : i32
    %11 = arith.cmpi slt, %4, %c0_i32_4 : i32
    %12 = vector.broadcast %11 : i1 to vector<1x256xi1>
    %13 = vector.broadcast %12 : vector<1x256xi1> to vector<1x256xi1>
    %14 = arith.xori %10, %13 : vector<1x256xi1>
    %15 = arith.andi %14, %8 : vector<1x256xi1>
    %16 = vector.broadcast %4 : i32 to vector<1x256xi32>
    %17 = arith.addi %6, %16 : vector<1x256xi32>
    %18 = arith.select %15, %17, %6 : vector<1x256xi1>, vector<1x256xi32>
    %c1_i32_5 = arith.constant 1 : i32
    %19 = vector.broadcast %c1_i32_5 : i32 to vector<1x256xi32>
    %20 = arith.cmpi sge, %18, %19 : vector<1x256xi32>
    %c14_i32 = arith.constant 14 : i32
    %21 = vector.broadcast %c14_i32 : i32 to vector<1x256xi32>
    %22 = arith.cmpi sle, %18, %21 : vector<1x256xi32>
    %cst = arith.constant 0.000000e+00 : f32
    %23 = vector.broadcast %cst : f32 to vector<32x256xf32>
    %cst_6 = arith.constant 0.000000e+00 : f32
    %24 = vector.broadcast %cst_6 : f32 to vector<32x17xf32>
    %25 = vector.extract_strided_slice %1 {offsets = [0, 0], sizes = [32, 239], strides = [1, 1]} : vector<32x256xf32> to vector<32x239xf32>
    %26 = tpu.concatenate %24, %25 in 1 : vector<32x17xf32>, vector<32x239xf32> -> vector<32x256xf32>
    %cst_7 = arith.constant 0.000000e+00 : f32
    %27 = vector.shape_cast %20 : vector<1x256xi1> to vector<1x256xi1>
    %28 = vector.broadcast %27 : vector<1x256xi1> to vector<32x256xi1>
    %29 = vector.broadcast %cst_7 : f32 to vector<32x256xf32>
    %30 = arith.select %28, %26, %29 : vector<32x256xi1>, vector<32x256xf32>
    %c0_8 = arith.constant 0 : index
    %c0_9 = arith.constant 0 : index
    %c0_10 = arith.constant 0 : index
    %c0_11 = arith.constant 0 : index
    %31 = vector.load %arg2[%c0_8, %c0_9, %c0_10, %c0_11] : memref<3x3x32x1xf32, #tpu.memory_space<vmem>>, vector<1x1x32x1xf32>
    %32 = vector.shape_cast %31 : vector<1x1x32x1xf32> to vector<32x1xf32>
    %33 = vector.broadcast %32 : vector<32x1xf32> to vector<32x256xf32>
    %34 = arith.mulf %30, %33 : vector<32x256xf32>
    %35 = arith.addf %23, %34 : vector<32x256xf32>
    %cst_12 = arith.constant 0.000000e+00 : f32
    %36 = vector.broadcast %cst_12 : f32 to vector<32x16xf32>
    %37 = vector.extract_strided_slice %1 {offsets = [0, 0], sizes = [32, 240], strides = [1, 1]} : vector<32x256xf32> to vector<32x240xf32>
    %38 = tpu.concatenate %36, %37 in 1 : vector<32x16xf32>, vector<32x240xf32> -> vector<32x256xf32>
    %c0_13 = arith.constant 0 : index
    %c1 = arith.constant 1 : index
    %c0_14 = arith.constant 0 : index
    %c0_15 = arith.constant 0 : index
    %39 = vector.load %arg2[%c0_13, %c1, %c0_14, %c0_15] : memref<3x3x32x1xf32, #tpu.memory_space<vmem>>, vector<1x1x32x1xf32>
    %40 = vector.shape_cast %39 : vector<1x1x32x1xf32> to vector<32x1xf32>
    %41 = vector.broadcast %40 : vector<32x1xf32> to vector<32x256xf32>
    %42 = arith.mulf %38, %41 : vector<32x256xf32>
    %43 = arith.addf %35, %42 : vector<32x256xf32>
    %cst_16 = arith.constant 0.000000e+00 : f32
    %44 = vector.broadcast %cst_16 : f32 to vector<32x15xf32>
    %45 = vector.extract_strided_slice %1 {offsets = [0, 0], sizes = [32, 241], strides = [1, 1]} : vector<32x256xf32> to vector<32x241xf32>
    %46 = tpu.concatenate %44, %45 in 1 : vector<32x15xf32>, vector<32x241xf32> -> vector<32x256xf32>
    %cst_17 = arith.constant 0.000000e+00 : f32
    %47 = vector.shape_cast %22 : vector<1x256xi1> to vector<1x256xi1>
    %48 = vector.broadcast %47 : vector<1x256xi1> to vector<32x256xi1>
    %49 = vector.broadcast %cst_17 : f32 to vector<32x256xf32>
    %50 = arith.select %48, %46, %49 : vector<32x256xi1>, vector<32x256xf32>
    %c0_18 = arith.constant 0 : index
    %c2 = arith.constant 2 : index
    %c0_19 = arith.constant 0 : index
    %c0_20 = arith.constant 0 : index
    %51 = vector.load %arg2[%c0_18, %c2, %c0_19, %c0_20] : memref<3x3x32x1xf32, #tpu.memory_space<vmem>>, vector<1x1x32x1xf32>
    %52 = vector.shape_cast %51 : vector<1x1x32x1xf32> to vector<32x1xf32>
    %53 = vector.broadcast %52 : vector<32x1xf32> to vector<32x256xf32>
    %54 = arith.mulf %50, %53 : vector<32x256xf32>
    %55 = arith.addf %43, %54 : vector<32x256xf32>
    %cst_21 = arith.constant 0.000000e+00 : f32
    %56 = vector.broadcast %cst_21 : f32 to vector<32x1xf32>
    %57 = vector.extract_strided_slice %1 {offsets = [0, 0], sizes = [32, 255], strides = [1, 1]} : vector<32x256xf32> to vector<32x255xf32>
    %58 = tpu.concatenate %56, %57 in 1 : vector<32x1xf32>, vector<32x255xf32> -> vector<32x256xf32>
    %cst_22 = arith.constant 0.000000e+00 : f32
    %59 = vector.shape_cast %20 : vector<1x256xi1> to vector<1x256xi1>
    %60 = vector.broadcast %59 : vector<1x256xi1> to vector<32x256xi1>
    %61 = vector.broadcast %cst_22 : f32 to vector<32x256xf32>
    %62 = arith.select %60, %58, %61 : vector<32x256xi1>, vector<32x256xf32>
    %c1_23 = arith.constant 1 : index
    %c0_24 = arith.constant 0 : index
    %c0_25 = arith.constant 0 : index
    %c0_26 = arith.constant 0 : index
    %63 = vector.load %arg2[%c1_23, %c0_24, %c0_25, %c0_26] : memref<3x3x32x1xf32, #tpu.memory_space<vmem>>, vector<1x1x32x1xf32>
    %64 = vector.shape_cast %63 : vector<1x1x32x1xf32> to vector<32x1xf32>
    %65 = vector.broadcast %64 : vector<32x1xf32> to vector<32x256xf32>
    %66 = arith.mulf %62, %65 : vector<32x256xf32>
    %67 = arith.addf %55, %66 : vector<32x256xf32>
    %c1_27 = arith.constant 1 : index
    %c1_28 = arith.constant 1 : index
    %c0_29 = arith.constant 0 : index
    %c0_30 = arith.constant 0 : index
    %68 = vector.load %arg2[%c1_27, %c1_28, %c0_29, %c0_30] : memref<3x3x32x1xf32, #tpu.memory_space<vmem>>, vector<1x1x32x1xf32>
    %69 = vector.shape_cast %68 : vector<1x1x32x1xf32> to vector<32x1xf32>
    %70 = vector.broadcast %69 : vector<32x1xf32> to vector<32x256xf32>
    %71 = arith.mulf %1, %70 : vector<32x256xf32>
    %72 = arith.addf %67, %71 : vector<32x256xf32>
    %cst_31 = arith.constant 0.000000e+00 : f32
    %73 = vector.broadcast %cst_31 : f32 to vector<32x1xf32>
    %74 = vector.extract_strided_slice %1 {offsets = [0, 1], sizes = [32, 255], strides = [1, 1]} : vector<32x256xf32> to vector<32x255xf32>
    %75 = tpu.concatenate %74, %73 in 1 : vector<32x255xf32>, vector<32x1xf32> -> vector<32x256xf32>
    %cst_32 = arith.constant 0.000000e+00 : f32
    %76 = vector.shape_cast %22 : vector<1x256xi1> to vector<1x256xi1>
    %77 = vector.broadcast %76 : vector<1x256xi1> to vector<32x256xi1>
    %78 = vector.broadcast %cst_32 : f32 to vector<32x256xf32>
    %79 = arith.select %77, %75, %78 : vector<32x256xi1>, vector<32x256xf32>
    %c1_33 = arith.constant 1 : index
    %c2_34 = arith.constant 2 : index
    %c0_35 = arith.constant 0 : index
    %c0_36 = arith.constant 0 : index
    %80 = vector.load %arg2[%c1_33, %c2_34, %c0_35, %c0_36] : memref<3x3x32x1xf32, #tpu.memory_space<vmem>>, vector<1x1x32x1xf32>
    %81 = vector.shape_cast %80 : vector<1x1x32x1xf32> to vector<32x1xf32>
    %82 = vector.broadcast %81 : vector<32x1xf32> to vector<32x256xf32>
    %83 = arith.mulf %79, %82 : vector<32x256xf32>
    %84 = arith.addf %72, %83 : vector<32x256xf32>
    %cst_37 = arith.constant 0.000000e+00 : f32
    %85 = vector.broadcast %cst_37 : f32 to vector<32x15xf32>
    %86 = vector.extract_strided_slice %1 {offsets = [0, 15], sizes = [32, 241], strides = [1, 1]} : vector<32x256xf32> to vector<32x241xf32>
    %87 = tpu.concatenate %86, %85 in 1 : vector<32x241xf32>, vector<32x15xf32> -> vector<32x256xf32>
    %cst_38 = arith.constant 0.000000e+00 : f32
    %88 = vector.shape_cast %20 : vector<1x256xi1> to vector<1x256xi1>
    %89 = vector.broadcast %88 : vector<1x256xi1> to vector<32x256xi1>
    %90 = vector.broadcast %cst_38 : f32 to vector<32x256xf32>
    %91 = arith.select %89, %87, %90 : vector<32x256xi1>, vector<32x256xf32>
    %c2_39 = arith.constant 2 : index
    %c0_40 = arith.constant 0 : index
    %c0_41 = arith.constant 0 : index
    %c0_42 = arith.constant 0 : index
    %92 = vector.load %arg2[%c2_39, %c0_40, %c0_41, %c0_42] : memref<3x3x32x1xf32, #tpu.memory_space<vmem>>, vector<1x1x32x1xf32>
    %93 = vector.shape_cast %92 : vector<1x1x32x1xf32> to vector<32x1xf32>
    %94 = vector.broadcast %93 : vector<32x1xf32> to vector<32x256xf32>
    %95 = arith.mulf %91, %94 : vector<32x256xf32>
    %96 = arith.addf %84, %95 : vector<32x256xf32>
    %cst_43 = arith.constant 0.000000e+00 : f32
    %97 = vector.broadcast %cst_43 : f32 to vector<32x16xf32>
    %98 = vector.extract_strided_slice %1 {offsets = [0, 16], sizes = [32, 240], strides = [1, 1]} : vector<32x256xf32> to vector<32x240xf32>
    %99 = tpu.concatenate %98, %97 in 1 : vector<32x240xf32>, vector<32x16xf32> -> vector<32x256xf32>
    %c2_44 = arith.constant 2 : index
    %c1_45 = arith.constant 1 : index
    %c0_46 = arith.constant 0 : index
    %c0_47 = arith.constant 0 : index
    %100 = vector.load %arg2[%c2_44, %c1_45, %c0_46, %c0_47] : memref<3x3x32x1xf32, #tpu.memory_space<vmem>>, vector<1x1x32x1xf32>
    %101 = vector.shape_cast %100 : vector<1x1x32x1xf32> to vector<32x1xf32>
    %102 = vector.broadcast %101 : vector<32x1xf32> to vector<32x256xf32>
    %103 = arith.mulf %99, %102 : vector<32x256xf32>
    %104 = arith.addf %96, %103 : vector<32x256xf32>
    %cst_48 = arith.constant 0.000000e+00 : f32
    %105 = vector.broadcast %cst_48 : f32 to vector<32x17xf32>
    %106 = vector.extract_strided_slice %1 {offsets = [0, 17], sizes = [32, 239], strides = [1, 1]} : vector<32x256xf32> to vector<32x239xf32>
    %107 = tpu.concatenate %106, %105 in 1 : vector<32x239xf32>, vector<32x17xf32> -> vector<32x256xf32>
    %cst_49 = arith.constant 0.000000e+00 : f32
    %108 = vector.shape_cast %22 : vector<1x256xi1> to vector<1x256xi1>
    %109 = vector.broadcast %108 : vector<1x256xi1> to vector<32x256xi1>
    %110 = vector.broadcast %cst_49 : f32 to vector<32x256xf32>
    %111 = arith.select %109, %107, %110 : vector<32x256xi1>, vector<32x256xf32>
    %c2_50 = arith.constant 2 : index
    %c2_51 = arith.constant 2 : index
    %c0_52 = arith.constant 0 : index
    %c0_53 = arith.constant 0 : index
    %112 = vector.load %arg2[%c2_50, %c2_51, %c0_52, %c0_53] : memref<3x3x32x1xf32, #tpu.memory_space<vmem>>, vector<1x1x32x1xf32>
    %113 = vector.shape_cast %112 : vector<1x1x32x1xf32> to vector<32x1xf32>
    %114 = vector.broadcast %113 : vector<32x1xf32> to vector<32x256xf32>
    %115 = arith.mulf %111, %114 : vector<32x256xf32>
    %116 = arith.addf %104, %115 : vector<32x256xf32>
    %cst_54 = arith.constant 0.000000e+00 : f32
    %117 = vector.broadcast %cst_54 : f32 to vector<32x256xf32>
    %118 = arith.maximumf %116, %117 : vector<32x256xf32>
    %cst_55 = arith.constant 6.000000e+00 : f32
    %119 = vector.broadcast %cst_55 : f32 to vector<32x256xf32>
    %120 = arith.minimumf %118, %119 : vector<32x256xf32>
    %c0_56 = arith.constant 0 : index
    %c0_57 = arith.constant 0 : index
    %121 = vector.load %arg3[%c0_56, %c0_57] : memref<32x32xf32, #tpu.memory_space<vmem>>, vector<32x32xf32>
    %cst_58 = arith.constant dense<0.000000e+00> : vector<32x256xf32>
    %122 = tpu.matmul %121, %120, %cst_58 {dimension_numbers = #tpu.dot_dimension_numbers<[1], [0], [0], [1], [0, 0, 1, 1], [], []>} : vector<32x32xf32>, vector<32x256xf32>, vector<32x256xf32> -> vector<32x256xf32>
    %cst_59 = arith.constant 0.000000e+00 : f32
    %123 = vector.broadcast %cst_59 : f32 to vector<32x256xf32>
    %124 = arith.maximumf %122, %123 : vector<32x256xf32>
    %cst_60 = arith.constant 6.000000e+00 : f32
    %125 = vector.broadcast %cst_60 : f32 to vector<32x256xf32>
    %126 = arith.minimumf %124, %125 : vector<32x256xf32>
    %cst_61 = arith.constant 0.000000e+00 : f32
    %127 = vector.broadcast %cst_61 : f32 to vector<32x256xf32>
    %cst_62 = arith.constant 0.000000e+00 : f32
    %128 = vector.broadcast %cst_62 : f32 to vector<32x17xf32>
    %129 = vector.extract_strided_slice %126 {offsets = [0, 0], sizes = [32, 239], strides = [1, 1]} : vector<32x256xf32> to vector<32x239xf32>
    %130 = tpu.concatenate %128, %129 in 1 : vector<32x17xf32>, vector<32x239xf32> -> vector<32x256xf32>
    %cst_63 = arith.constant 0.000000e+00 : f32
    %131 = vector.shape_cast %20 : vector<1x256xi1> to vector<1x256xi1>
    %132 = vector.broadcast %131 : vector<1x256xi1> to vector<32x256xi1>
    %133 = vector.broadcast %cst_63 : f32 to vector<32x256xf32>
    %134 = arith.select %132, %130, %133 : vector<32x256xi1>, vector<32x256xf32>
    %c0_64 = arith.constant 0 : index
    %c0_65 = arith.constant 0 : index
    %c0_66 = arith.constant 0 : index
    %c0_67 = arith.constant 0 : index
    %135 = vector.load %arg4[%c0_64, %c0_65, %c0_66, %c0_67] : memref<3x3x32x1xf32, #tpu.memory_space<vmem>>, vector<1x1x32x1xf32>
    %136 = vector.shape_cast %135 : vector<1x1x32x1xf32> to vector<32x1xf32>
    %137 = vector.broadcast %136 : vector<32x1xf32> to vector<32x256xf32>
    %138 = arith.mulf %134, %137 : vector<32x256xf32>
    %139 = arith.addf %127, %138 : vector<32x256xf32>
    %cst_68 = arith.constant 0.000000e+00 : f32
    %140 = vector.broadcast %cst_68 : f32 to vector<32x16xf32>
    %141 = vector.extract_strided_slice %126 {offsets = [0, 0], sizes = [32, 240], strides = [1, 1]} : vector<32x256xf32> to vector<32x240xf32>
    %142 = tpu.concatenate %140, %141 in 1 : vector<32x16xf32>, vector<32x240xf32> -> vector<32x256xf32>
    %c0_69 = arith.constant 0 : index
    %c1_70 = arith.constant 1 : index
    %c0_71 = arith.constant 0 : index
    %c0_72 = arith.constant 0 : index
    %143 = vector.load %arg4[%c0_69, %c1_70, %c0_71, %c0_72] : memref<3x3x32x1xf32, #tpu.memory_space<vmem>>, vector<1x1x32x1xf32>
    %144 = vector.shape_cast %143 : vector<1x1x32x1xf32> to vector<32x1xf32>
    %145 = vector.broadcast %144 : vector<32x1xf32> to vector<32x256xf32>
    %146 = arith.mulf %142, %145 : vector<32x256xf32>
    %147 = arith.addf %139, %146 : vector<32x256xf32>
    %cst_73 = arith.constant 0.000000e+00 : f32
    %148 = vector.broadcast %cst_73 : f32 to vector<32x15xf32>
    %149 = vector.extract_strided_slice %126 {offsets = [0, 0], sizes = [32, 241], strides = [1, 1]} : vector<32x256xf32> to vector<32x241xf32>
    %150 = tpu.concatenate %148, %149 in 1 : vector<32x15xf32>, vector<32x241xf32> -> vector<32x256xf32>
    %cst_74 = arith.constant 0.000000e+00 : f32
    %151 = vector.shape_cast %22 : vector<1x256xi1> to vector<1x256xi1>
    %152 = vector.broadcast %151 : vector<1x256xi1> to vector<32x256xi1>
    %153 = vector.broadcast %cst_74 : f32 to vector<32x256xf32>
    %154 = arith.select %152, %150, %153 : vector<32x256xi1>, vector<32x256xf32>
    %c0_75 = arith.constant 0 : index
    %c2_76 = arith.constant 2 : index
    %c0_77 = arith.constant 0 : index
    %c0_78 = arith.constant 0 : index
    %155 = vector.load %arg4[%c0_75, %c2_76, %c0_77, %c0_78] : memref<3x3x32x1xf32, #tpu.memory_space<vmem>>, vector<1x1x32x1xf32>
    %156 = vector.shape_cast %155 : vector<1x1x32x1xf32> to vector<32x1xf32>
    %157 = vector.broadcast %156 : vector<32x1xf32> to vector<32x256xf32>
    %158 = arith.mulf %154, %157 : vector<32x256xf32>
    %159 = arith.addf %147, %158 : vector<32x256xf32>
    %cst_79 = arith.constant 0.000000e+00 : f32
    %160 = vector.broadcast %cst_79 : f32 to vector<32x1xf32>
    %161 = vector.extract_strided_slice %126 {offsets = [0, 0], sizes = [32, 255], strides = [1, 1]} : vector<32x256xf32> to vector<32x255xf32>
    %162 = tpu.concatenate %160, %161 in 1 : vector<32x1xf32>, vector<32x255xf32> -> vector<32x256xf32>
    %cst_80 = arith.constant 0.000000e+00 : f32
    %163 = vector.shape_cast %20 : vector<1x256xi1> to vector<1x256xi1>
    %164 = vector.broadcast %163 : vector<1x256xi1> to vector<32x256xi1>
    %165 = vector.broadcast %cst_80 : f32 to vector<32x256xf32>
    %166 = arith.select %164, %162, %165 : vector<32x256xi1>, vector<32x256xf32>
    %c1_81 = arith.constant 1 : index
    %c0_82 = arith.constant 0 : index
    %c0_83 = arith.constant 0 : index
    %c0_84 = arith.constant 0 : index
    %167 = vector.load %arg4[%c1_81, %c0_82, %c0_83, %c0_84] : memref<3x3x32x1xf32, #tpu.memory_space<vmem>>, vector<1x1x32x1xf32>
    %168 = vector.shape_cast %167 : vector<1x1x32x1xf32> to vector<32x1xf32>
    %169 = vector.broadcast %168 : vector<32x1xf32> to vector<32x256xf32>
    %170 = arith.mulf %166, %169 : vector<32x256xf32>
    %171 = arith.addf %159, %170 : vector<32x256xf32>
    %c1_85 = arith.constant 1 : index
    %c1_86 = arith.constant 1 : index
    %c0_87 = arith.constant 0 : index
    %c0_88 = arith.constant 0 : index
    %172 = vector.load %arg4[%c1_85, %c1_86, %c0_87, %c0_88] : memref<3x3x32x1xf32, #tpu.memory_space<vmem>>, vector<1x1x32x1xf32>
    %173 = vector.shape_cast %172 : vector<1x1x32x1xf32> to vector<32x1xf32>
    %174 = vector.broadcast %173 : vector<32x1xf32> to vector<32x256xf32>
    %175 = arith.mulf %126, %174 : vector<32x256xf32>
    %176 = arith.addf %171, %175 : vector<32x256xf32>
    %cst_89 = arith.constant 0.000000e+00 : f32
    %177 = vector.broadcast %cst_89 : f32 to vector<32x1xf32>
    %178 = vector.extract_strided_slice %126 {offsets = [0, 1], sizes = [32, 255], strides = [1, 1]} : vector<32x256xf32> to vector<32x255xf32>
    %179 = tpu.concatenate %178, %177 in 1 : vector<32x255xf32>, vector<32x1xf32> -> vector<32x256xf32>
    %cst_90 = arith.constant 0.000000e+00 : f32
    %180 = vector.shape_cast %22 : vector<1x256xi1> to vector<1x256xi1>
    %181 = vector.broadcast %180 : vector<1x256xi1> to vector<32x256xi1>
    %182 = vector.broadcast %cst_90 : f32 to vector<32x256xf32>
    %183 = arith.select %181, %179, %182 : vector<32x256xi1>, vector<32x256xf32>
    %c1_91 = arith.constant 1 : index
    %c2_92 = arith.constant 2 : index
    %c0_93 = arith.constant 0 : index
    %c0_94 = arith.constant 0 : index
    %184 = vector.load %arg4[%c1_91, %c2_92, %c0_93, %c0_94] : memref<3x3x32x1xf32, #tpu.memory_space<vmem>>, vector<1x1x32x1xf32>
    %185 = vector.shape_cast %184 : vector<1x1x32x1xf32> to vector<32x1xf32>
    %186 = vector.broadcast %185 : vector<32x1xf32> to vector<32x256xf32>
    %187 = arith.mulf %183, %186 : vector<32x256xf32>
    %188 = arith.addf %176, %187 : vector<32x256xf32>
    %cst_95 = arith.constant 0.000000e+00 : f32
    %189 = vector.broadcast %cst_95 : f32 to vector<32x15xf32>
    %190 = vector.extract_strided_slice %126 {offsets = [0, 15], sizes = [32, 241], strides = [1, 1]} : vector<32x256xf32> to vector<32x241xf32>
    %191 = tpu.concatenate %190, %189 in 1 : vector<32x241xf32>, vector<32x15xf32> -> vector<32x256xf32>
    %cst_96 = arith.constant 0.000000e+00 : f32
    %192 = vector.shape_cast %20 : vector<1x256xi1> to vector<1x256xi1>
    %193 = vector.broadcast %192 : vector<1x256xi1> to vector<32x256xi1>
    %194 = vector.broadcast %cst_96 : f32 to vector<32x256xf32>
    %195 = arith.select %193, %191, %194 : vector<32x256xi1>, vector<32x256xf32>
    %c2_97 = arith.constant 2 : index
    %c0_98 = arith.constant 0 : index
    %c0_99 = arith.constant 0 : index
    %c0_100 = arith.constant 0 : index
    %196 = vector.load %arg4[%c2_97, %c0_98, %c0_99, %c0_100] : memref<3x3x32x1xf32, #tpu.memory_space<vmem>>, vector<1x1x32x1xf32>
    %197 = vector.shape_cast %196 : vector<1x1x32x1xf32> to vector<32x1xf32>
    %198 = vector.broadcast %197 : vector<32x1xf32> to vector<32x256xf32>
    %199 = arith.mulf %195, %198 : vector<32x256xf32>
    %200 = arith.addf %188, %199 : vector<32x256xf32>
    %cst_101 = arith.constant 0.000000e+00 : f32
    %201 = vector.broadcast %cst_101 : f32 to vector<32x16xf32>
    %202 = vector.extract_strided_slice %126 {offsets = [0, 16], sizes = [32, 240], strides = [1, 1]} : vector<32x256xf32> to vector<32x240xf32>
    %203 = tpu.concatenate %202, %201 in 1 : vector<32x240xf32>, vector<32x16xf32> -> vector<32x256xf32>
    %c2_102 = arith.constant 2 : index
    %c1_103 = arith.constant 1 : index
    %c0_104 = arith.constant 0 : index
    %c0_105 = arith.constant 0 : index
    %204 = vector.load %arg4[%c2_102, %c1_103, %c0_104, %c0_105] : memref<3x3x32x1xf32, #tpu.memory_space<vmem>>, vector<1x1x32x1xf32>
    %205 = vector.shape_cast %204 : vector<1x1x32x1xf32> to vector<32x1xf32>
    %206 = vector.broadcast %205 : vector<32x1xf32> to vector<32x256xf32>
    %207 = arith.mulf %203, %206 : vector<32x256xf32>
    %208 = arith.addf %200, %207 : vector<32x256xf32>
    %cst_106 = arith.constant 0.000000e+00 : f32
    %209 = vector.broadcast %cst_106 : f32 to vector<32x17xf32>
    %210 = vector.extract_strided_slice %126 {offsets = [0, 17], sizes = [32, 239], strides = [1, 1]} : vector<32x256xf32> to vector<32x239xf32>
    %211 = tpu.concatenate %210, %209 in 1 : vector<32x239xf32>, vector<32x17xf32> -> vector<32x256xf32>
    %cst_107 = arith.constant 0.000000e+00 : f32
    %212 = vector.shape_cast %22 : vector<1x256xi1> to vector<1x256xi1>
    %213 = vector.broadcast %212 : vector<1x256xi1> to vector<32x256xi1>
    %214 = vector.broadcast %cst_107 : f32 to vector<32x256xf32>
    %215 = arith.select %213, %211, %214 : vector<32x256xi1>, vector<32x256xf32>
    %c2_108 = arith.constant 2 : index
    %c2_109 = arith.constant 2 : index
    %c0_110 = arith.constant 0 : index
    %c0_111 = arith.constant 0 : index
    %216 = vector.load %arg4[%c2_108, %c2_109, %c0_110, %c0_111] : memref<3x3x32x1xf32, #tpu.memory_space<vmem>>, vector<1x1x32x1xf32>
    %217 = vector.shape_cast %216 : vector<1x1x32x1xf32> to vector<32x1xf32>
    %218 = vector.broadcast %217 : vector<32x1xf32> to vector<32x256xf32>
    %219 = arith.mulf %215, %218 : vector<32x256xf32>
    %220 = arith.addf %208, %219 : vector<32x256xf32>
    %221 = arith.addf %220, %1 : vector<32x256xf32>
    %c0_112 = arith.constant 0 : index
    %c0_113 = arith.constant 0 : index
    %c0_114 = arith.constant 0 : index
    %222 = vector.load %arg5[%c0_112, %c0_113, %c0_114] : memref<1x32x256xf32, #tpu.memory_space<vmem>>, vector<1x32x256xf32>
    %223 = vector.shape_cast %222 : vector<1x32x256xf32> to vector<32x256xf32>
    %224 = vector.shape_cast %221 : vector<32x256xf32> to vector<1x32x256xf32>
    tpu.vector_store %arg5[%c0_112, %c0_113, %c0_114], %224 {strides = array<i32>} : memref<1x32x256xf32, #tpu.memory_space<vmem>>, vector<1x32x256xf32>,
    return
  }
  func.func @transform_0(%arg0: i32) -> (i32, i32, i32) {
    %c0_i32 = arith.constant 0 : i32
    %c0_i32_0 = arith.constant 0 : i32
    %c0_i32_1 = arith.constant 0 : i32
    return %arg0, %c0_i32, %c0_i32_0 : i32, i32, i32
  }
  func.func @transform_1(%arg0: i32) -> (i32, i32, i32, i32) {
    %c0_i32 = arith.constant 0 : i32
    %c0_i32_0 = arith.constant 0 : i32
    %c0_i32_1 = arith.constant 0 : i32
    %c0_i32_2 = arith.constant 0 : i32
    %c0_i32_3 = arith.constant 0 : i32
    return %c0_i32, %c0_i32_0, %c0_i32_1, %c0_i32_2 : i32, i32, i32, i32
  }
  func.func @transform_2(%arg0: i32) -> (i32, i32) {
    %c0_i32 = arith.constant 0 : i32
    %c0_i32_0 = arith.constant 0 : i32
    %c0_i32_1 = arith.constant 0 : i32
    return %c0_i32, %c0_i32_0 : i32, i32
  }
  func.func @transform_3(%arg0: i32) -> (i32, i32, i32, i32) {
    %c0_i32 = arith.constant 0 : i32
    %c0_i32_0 = arith.constant 0 : i32
    %c0_i32_1 = arith.constant 0 : i32
    %c0_i32_2 = arith.constant 0 : i32
    %c0_i32_3 = arith.constant 0 : i32
    return %c0_i32, %c0_i32_0, %c0_i32_1, %c0_i32_2 : i32, i32, i32, i32
  }
  func.func @transform_4(%arg0: i32) -> (i32, i32, i32) {
    %c0_i32 = arith.constant 0 : i32
    %c0_i32_0 = arith.constant 0 : i32
    %c0_i32_1 = arith.constant 0 : i32
    return %arg0, %c0_i32, %c0_i32_0 : i32, i32, i32
  }
}

</mosaic_0001>

<bundles_post_ra>
// kernel: tpu_custom_call.1
= control target key start
LH: loop header
LB: loop body
LE: loop exit
PB: predicated region body
PF: predicated region fallthrough
CT: control target
= control target key end

     0   :  { %9 = vsyncpa [#allocation3], 0  ;;  %s3630_s0 = inlined_call_operand.vmem [shape: f32[2,32,256], index: 0, kind: input, shape index: {}]   ;;  %s3631_s1 = inlined_call_operand.vmem [shape: f32[3,3,32,1], index: 1, kind: input, shape index: {}]   ;;  %s3632_s2 = inlined_call_operand.vmem [shape: f32[32,32], index: 2, kind: input, shape index: {}]   ;;  %s3633_s3 = inlined_call_operand.vmem [shape: f32[3,3,32,1], index: 3, kind: input, shape index: {}]   ;;  %s3634_s4 = inlined_call_operand.hbm [shape: f32[2,32,256], index: 4, kind: output, shape index: {}]  }
   0x1   :  { %11 = vsyncpa [#allocation3 + $0x1], 0  ;;  %s2090_s15 = smov 0   ;;  %s2092_s16 = smov 0  }
   0x2   :  { %s2094_s17 = smov 0   ;;  %s2096_s18 = smov 0  }
   0x3 LB: > { %s2111_s19 = sadd.s32 4294967295, %s2051_s18   ;;  %s1841_s20 = sadd.s32 4294967294, %s2051_s18   ;;  %s2051_s18 = sphi %s2096_s18, %s3743_s18   ;;  %s2047_s17 = sphi %s2094_s17, %s3742_s17   ;;  %s2043_s16 = sphi %s2092_s16, %s3741_s16   ;;  %s2039_s15 = sphi %s2090_s15, %s3740_s15  }
   0x4   : > { %s2115_s21 = sadd.s32 1, %s2051_s18   ;;  %s113_s22 = sadd.s32 1, %s2047_s17 }
   0x5   : > { %s110_s23 = ssub.s32 %s2051_s18, %s2115_s21  ;;  %p123_p0 = scmp.ne.s32.totalorder %s2047_s17, %s2043_s16 }
   0x6   : > { %p111_p1 = scmp.eq.s32.totalorder %s110_s23, 0  ;;  %p124_p2 = scmp.eq.s32.totalorder %s2111_s19, 1 }
   0x7   : > { %p129_p3 = scmp.ne.s32.totalorder %s2043_s16, %s2039_s15  ;;  %p130_p4 = scmp.eq.s32.totalorder %s1841_s20, 1 }
   0x8   : > { %s2126_s24 = scalar_select %p111_p1, %s2047_s17, %s113_s22  }
   0x9   : > { %p2128_p5 = por %p124_p2, %p123_p0  ;;  %p2132_p6 = por %p130_p4, %p129_p3 }
   0xa   : > { %p1844_p7 = scmp.ge.s32.totalorder %s2051_s18, 1  ;;  %p165_p8 = scmp.lt.s32.totalorder %s2051_s18, 3 }
   0xc   : > { %p166_p9 = pnand %p1844_p7, %p165_p8 }
   0xe   : > { %169 = sbr.rel (%p166_p9) target bundleno = 839 (0x347), region = 36 }
  0x13   : > { %p191_p10 = scmp.lt.s32.totalorder %s2111_s19, 1  ;;  %v2053_v0 = vmov 0   ;;  %s2054_s6 = smov 17   ;;  %v289_v9 = vld [vmem:[%s3631_s1 + $0x8] sm:$0xff]  ;;  %v288_v10 = vld [vmem:[%s3631_s1] sm:$0xff]  ;;  %v290_v11 = vld [vmem:[%s3631_s1 + $0x10] sm:$0xff] }
  0x14   : > { %1982 = vset.pattern.permute.xlu1 %v2053_v0  ;;  %1981 = vset.pattern.permute.xlu0 %v2053_v0  ;;  %v291_v12 = vld [vmem:[%s3631_s1 + $0x18] sm:$0xff]  ;;  %s2055_s20 = smov 16   ;;  %v1848_v13 = vld [vmem:[%s3631_s1 + $0x20] sm:$0xff]  ;;  %v1849_v14 = vld [vmem:[%s3631_s1 + $0x28] sm:$0xff]  ;;  %s2056_s9 = smov 15   ;;  %vm259_vm0 = vcmask 138240  }
  0x15   : > { %s192_s27 = scalar_select %p191_p10, %s2111_s19, 1  ;;  %v1850_v15 = vld [vmem:[%s3631_s1 + $0x30] sm:$0xff]  ;;  %v1851_v16 = vld [vmem:[%s3631_s1 + $0x38] sm:$0xff]  ;;  %v1852_v17 = vld [vmem:[%s3631_s1 + $0x40] sm:$0xff]  ;;  %vm344_vm3 = vcmask 130048   ;;  %vm418_vm4 = vcmask 121856  }
  0x16   : > { %v1853_v18 = vld [vmem:[%s3631_s1 + $0x48] sm:$0xff]  ;;  %v1854_v19 = vld [vmem:[%s3631_s1 + $0x50] sm:$0xff]  ;;  %v1855_v20 = vld [vmem:[%s3631_s1 + $0x58] sm:$0xff]  ;;  %s2058_s10 = smov 127   ;;  %s2059_s8 = smov 113   ;;  %vm504_vm7 = vcmask 7168  }
  0x17   : > { %s1921_s28 = sshll.u32 %s192_s27, 6  ;;  %v1856_v21 = vld [vmem:[%s3631_s1 + $0x60] sm:$0xff]  ;;  %v1857_v22 = vld [vmem:[%s3631_s1 + $0x68] sm:$0xff]  ;;  %v1858_v23 = vld [vmem:[%s3631_s1 + $0x70] sm:$0xff]  ;;  %s2060_s22 = smov 112   ;;  %vm709_vm8 = vcmask 924672  }
  0x18   : > { %s2143_s5 = scalar_lea.vmem %s3630_s0, %s1921_s28  ;;  %s2057_s28 = smov 1   ;;  %v1859_v24 = vld [vmem:[%s3631_s1 + $0x78] sm:$0xff]  ;;  %v1860_v25 = vld [vmem:[%s3631_s1 + $0x80] sm:$0xff]  ;;  %v1861_v26 = vld [vmem:[%s3631_s1 + $0x88] sm:$0xff]  ;;  %vm627_vm9 = vcmask 1039360   ;;  %vm791_vm10 = vcmask 916480  }
  0x19   : > { %v2146_v1 = vld [vmem:[%s2143_s5 + $0x10] sm:$0xff]  ;;  %v2149_v2 = vld [vmem:[%s2143_s5] sm:$0xff]  ;;  %v2156_v3 = vld [vmem:[%s2143_s5 + $0x18] sm:$0xff]  ;;  %s2061_s29 = smov 111   ;;  %vm865_vm11 = vcmask 908288   ;;  %vm951_vm12 = vcmask 261120  }
  0x1a   : > { %3665 = vst [vmem:[#allocation5_spill] sm:$0xff] %v2146_v1  ;;  %3666 = vst [vmem:[#allocation6_spill] sm:$0xff] %v2149_v2  ;;  %247 = vrot.lane.b32.xlu1 %v2146_v1, %s2054_s6  ;;  %243 = vrot.lane.b32.xlu0 %v2149_v2, %s2054_s6  ;;  %v2159_v4 = vld [vmem:[%s2143_s5 + $0x8] sm:$0xff]  ;;  %v2169_v6 = vld [vmem:[%s2143_s5 + $0x20] sm:$0xff]  ;;  %s1922_s11 = sshll.u32 %s2111_s19, 10  ;;  %s2063_s13 = smov [#allocation2]  }
  0x1b   : > { %3667 = vst [vmem:[#allocation7_spill] sm:$0xff] %v2156_v3  ;;  %3668 = vst [vmem:[#allocation8_spill] sm:$0xff] %v2159_v4  ;;  %v2166_v5 = vld [vmem:[%s2143_s5 + $0x28] sm:$0xff]  ;;  %v2176_v7 = vld [vmem:[%s2143_s5 + $0x38] sm:$0xff]  ;;  %s1995_s14 = sshll.u32 %s2063_s13, 4  ;;  %s1996_s14 = int_to_ptr.vmem [resolvable:$false] %s1995_s14 }
  0x1c   : > { %3669 = vst [vmem:[#allocation9_spill] sm:$0xff] %v2166_v5  ;;  %3670 = vst [vmem:[#allocation10_spill] sm:$0xff] %v2169_v6  ;;  %v2179_v8 = vld [vmem:[%s2143_s5 + $0x30] sm:$0xff]  ;;  %v1863_v28 = vld [vmem:[%s3631_s1 + $0x98] sm:$0xff] }
  0x1d   : > { %3671 = vst [vmem:[#allocation11_spill] sm:$0xff] %v2179_v8  ;;  %v1862_v27 = vld [vmem:[%s3631_s1 + $0x90] sm:$0xff]  ;;  %v1864_v31 = vld [vmem:[%s3631_s1 + $0xa0] sm:$0xff]  ;;  %v1865_v32 = vld [vmem:[%s3631_s1 + $0xa8] sm:$0xff] }
  0x1e   : > { %249 = vrot.lane.b32.xlu1 %v2156_v3, %s2054_s6  ;;  %245 = vrot.lane.b32.xlu0 %v2159_v4, %s2054_s6  ;;  %v1866_v33 = vld [vmem:[%s3631_s1 + $0xb0] sm:$0xff]  ;;  %v1867_v34 = vld [vmem:[%s3631_s1 + $0xb8] sm:$0xff] }
  0x1f   : > { %v1871_v37 = vld [vmem:[%s3631_s1 + $0xd8] sm:$0xff]  ;;  %v1870_v40 = vld [vmem:[%s3631_s1 + $0xd0] sm:$0xff]  ;;  %v1869_v44 = vld [vmem:[%s3631_s1 + $0xc8] sm:$0xff] }
  0x20   : > { %v1875_v41 = vld [vmem:[%s3631_s1 + $0xf8] sm:$0xff]  ;;  %v1874_v45 = vld [vmem:[%s3631_s1 + $0xf0] sm:$0xff]  ;;  %v1868_v51 = vld [vmem:[%s3631_s1 + $0xc0] sm:$0xff] }
  0x21   : > { %v1879_v48 = vld [vmem:[%s3631_s1 + $0x118] sm:$0xff]  ;;  %v1873_v54 = vld [vmem:[%s3631_s1 + $0xe8] sm:$0xff]  ;;  %v1878_v57 = vld [vmem:[%s3631_s1 + $0x110] sm:$0xff] }
  0x22   : > { %253 = vrot.lane.b32.xlu1 %v2166_v5, %s2054_s6  ;;  %251 = vrot.lane.b32.xlu0 %v2169_v6, %s2054_s6  ;;  %v1872_v0 = vld [vmem:[%s3631_s1 + $0xe0] sm:$0xff] }
  0x26   : > { %257 = vrot.lane.b32.xlu1 %v2176_v7, %s2054_s6  ;;  %255 = vrot.lane.b32.xlu0 %v2179_v8, %s2054_s6 }
  0x2a   : > { %299 = vperm.xlu1 %1982, %v289_v9   ;;  %294 = vperm.xlu0 %1981, %v288_v10  }
  0x2e   : > { %304 = vperm.xlu1 %1982, %v290_v11   ;;  %309 = vperm.xlu0 %1981, %v291_v12   ;;  %v1877_v11 = vld [vmem:[%s3631_s1 + $0x108] sm:$0xff] }
  0x32   : > { %328 = vrot.lane.b32.xlu1 %v2149_v2, %s2055_s20  ;;  %330 = vrot.lane.b32.xlu0 %v2159_v4, %s2055_s20 }
  0x36   : > { %332 = vrot.lane.b32.xlu1 %v2146_v1, %s2055_s20  ;;  %334 = vrot.lane.b32.xlu0 %v2156_v3, %s2055_s20 }
  0x3a   : > { %336 = vrot.lane.b32.xlu1 %v2169_v6, %s2055_s20  ;;  %338 = vrot.lane.b32.xlu0 %v2166_v5, %s2055_s20 }
  0x3e   : > { %340 = vrot.lane.b32.xlu1 %v2179_v8, %s2055_s20  ;;  %342 = vrot.lane.b32.xlu0 %v2176_v7, %s2055_s20 }
  0x42   : > { %368 = vperm.xlu1 %1982, %v1848_v13   ;;  %373 = vperm.xlu0 %1981, %v1849_v14  }
  0x46   : > { %378 = vperm.xlu1 %1982, %v1850_v15   ;;  %383 = vperm.xlu0 %1981, %v1851_v16  }
  0x4a   : > { %402 = vrot.lane.b32.xlu1 %v2149_v2, %s2056_s9  ;;  %404 = vrot.lane.b32.xlu0 %v2159_v4, %s2056_s9 }
  0x4e   : > { %406 = vrot.lane.b32.xlu1 %v2146_v1, %s2056_s9  ;;  %408 = vrot.lane.b32.xlu0 %v2156_v3, %s2056_s9 }
  0x52   : > { %410 = vrot.lane.b32.xlu1 %v2169_v6, %s2056_s9  ;;  %412 = vrot.lane.b32.xlu0 %v2166_v5, %s2056_s9 }
  0x56   : > { %414 = vrot.lane.b32.xlu1 %v2179_v8, %s2056_s9  ;;  %416 = vrot.lane.b32.xlu0 %v2176_v7, %s2056_s9 }
  0x5a   : > { %454 = vperm.xlu1 %1982, %v1852_v17   ;;  %459 = vperm.xlu0 %1981, %v1853_v18   ;;  %v1876_v18 = vld [vmem:[%s3631_s1 + $0x100] sm:$0xff] }
  0x5e   : > { %464 = vperm.xlu1 %1982, %v1854_v19   ;;  %469 = vperm.xlu0 %1981, %v1855_v20  }
  0x62   : > { %488 = vrot.lane.b32.xlu1 %v2149_v2, %s2057_s28  ;;  %490 = vrot.lane.b32.xlu0 %v2159_v4, %s2057_s28 }
  0x66   : > { %492 = vrot.lane.b32.xlu1 %v2146_v1, %s2057_s28  ;;  %494 = vrot.lane.b32.xlu0 %v2156_v3, %s2057_s28 }
  0x6a   : > { %496 = vrot.lane.b32.xlu1 %v2169_v6, %s2057_s28  ;;  %498 = vrot.lane.b32.xlu0 %v2166_v5, %s2057_s28 }
  0x6e   : > { %500 = vrot.lane.b32.xlu1 %v2179_v8, %s2057_s28  ;;  %502 = vrot.lane.b32.xlu0 %v2176_v7, %s2057_s28 }
  0x72   : > { %536 = vperm.xlu1 %1982, %v1856_v21   ;;  %541 = vperm.xlu0 %1981, %v1857_v22  }
  0x76   : > { %546 = vperm.xlu1 %1982, %v1858_v23   ;;  %551 = vperm.xlu0 %1981, %v1859_v24  }
  0x7a   : > { %577 = vperm.xlu1 %1982, %v1860_v25   ;;  %582 = vperm.xlu0 %1981, %v1861_v26  }
  0x7e   : > { %587 = vperm.xlu1 %1982, %v1862_v27   ;;  %592 = vperm.xlu0 %1981, %v1863_v28   ;;  %v1117_v27 = vld [vmem:[%s3633_s3] sm:$0xff]  ;;  %v1118_v28 = vld [vmem:[%s3633_s3 + $0x8] sm:$0xff] }
  0x82   : > { %611 = vrot.lane.b32.xlu1 %v2149_v2, %s2058_s10  ;;  %613 = vrot.lane.b32.xlu0 %v2159_v4, %s2058_s10 }
  0x86   : > { %615 = vrot.lane.b32.xlu1 %v2146_v1, %s2058_s10  ;;  %617 = vrot.lane.b32.xlu0 %v2156_v3, %s2058_s10 }
  0x8a   : > { %619 = vrot.lane.b32.xlu1 %v2169_v6, %s2058_s10  ;;  %621 = vrot.lane.b32.xlu0 %v2166_v5, %s2058_s10 }
  0x8c   : > { %v2309_v29 = vpop.permute.xlu1 %247  ;;  %v2311_v30 = vpop.permute.xlu0 %243 }
  0x8e   : > { %623 = vrot.lane.b32.xlu1 %v2179_v8, %s2058_s10  ;;  %625 = vrot.lane.b32.xlu0 %v2176_v7, %s2058_s10 }
  0x90   : > { %v2325_v35 = vpop.permute.xlu1 %249  ;;  %v2327_v36 = vpop.permute.xlu0 %245 }
  0x92   : > { %659 = vperm.xlu1 %1982, %v1864_v31   ;;  %664 = vperm.xlu0 %1981, %v1865_v32  }
  0x94   : > { %v2334_v38 = vpop.permute.xlu1 %253  ;;  %v2336_v39 = vpop.permute.xlu0 %251 }
  0x96   : > { %669 = vperm.xlu1 %1982, %v1866_v33   ;;  %674 = vperm.xlu0 %1981, %v1867_v34   ;;  %v1119_v33 = vld [vmem:[%s3633_s3 + $0x10] sm:$0xff]  ;;  %v1120_v34 = vld [vmem:[%s3633_s3 + $0x18] sm:$0xff] }
  0x98   : > { %v2344_v42 = vpop.permute.xlu1 %257  ;;  %v2346_v43 = vpop.permute.xlu0 %255 }
  0x9a   : > { %693 = vrot.lane.b32.xlu1 %v2149_v2, %s2059_s8  ;;  %756 = vperm.xlu0 %1981, %v1871_v37  }
  0x9e   : > { %751 = vperm.xlu1 %1982, %v1870_v40   ;;  %830 = vperm.xlu0 %1981, %v1875_v41   ;;  %v3635_v41 = vmov 0.0  }
  0x9f   : > { %1028 = vmatprep.mubr.f32.mxu0 %v3635_v41  ;;  %1040 = vmatprep.mubr.f32.mxu1 %v3635_v41 }
  0xa2   : > { %707 = vrot.lane.b32.xlu1 %v2176_v7, %s2059_s8  ;;  %705 = vrot.lane.b32.xlu0 %v2179_v8, %s2059_s8 }
  0xa5   : > { %v2358_v46 = vpop.permute.xlu1 %299  ;;  %v2360_v47 = vpop.permute.xlu0 %294 }
  0xa6   : > { %746 = vperm.xlu1 %1982, %v1869_v44   ;;  %825 = vperm.xlu0 %1981, %v1874_v45   ;;  %v1884_v44 = vld [vmem:[%s3633_s3 + $0x20] sm:$0xff]  ;;  %v1885_v45 = vld [vmem:[%s3633_s3 + $0x28] sm:$0xff] }
  0xa9   : > { %v2365_v49 = vpop.permute.xlu1 %304  ;;  %v2367_v50 = vpop.permute.xlu0 %309 }
  0xaa   : > { %912 = vperm.xlu1 %1982, %v1879_v48   ;;  %703 = vrot.lane.b32.xlu0 %v2166_v5, %s2059_s8 }
  0xad   : > { %v2374_v52 = vpop.permute.xlu1 %328  ;;  %v2376_v53 = vpop.permute.xlu0 %330 }
  0xae   : > { %701 = vrot.lane.b32.xlu1 %v2169_v6, %s2059_s8  ;;  %741 = vperm.xlu0 %1981, %v1868_v51  }
  0xb1   : > { %v2383_v55 = vpop.permute.xlu1 %332  ;;  %v2385_v56 = vpop.permute.xlu0 %334 }
  0xb2   : > { %789 = vrot.lane.b32.xlu1 %v2176_v7, %s2060_s22  ;;  %820 = vperm.xlu0 %1981, %v1873_v54   ;;  %v1886_v54 = vld [vmem:[%s3633_s3 + $0x30] sm:$0xff] }
  0xb5   : > { %v2392_v58 = vpop.permute.xlu1 %336  ;;  %v2394_v59 = vpop.permute.xlu0 %338 }
  0xb6   : > { %907 = vperm.xlu1 %1982, %v1878_v57   ;;  %699 = vrot.lane.b32.xlu0 %v2156_v3, %s2059_s8  ;;  %v1887_v57 = vld [vmem:[%s3633_s3 + $0x38] sm:$0xff] }
  0xb9   : > { %v2398_v60 = vpop.permute.xlu1 %340  ;;  %v2400_v61 = vpop.permute.xlu0 %342 }
  0xba   : > { %787 = vrot.lane.b32.xlu1 %v2179_v8, %s2060_s22  ;;  %863 = vrot.lane.b32.xlu0 %v2176_v7, %s2061_s29 }
  0xbd   : > { %v2406_v62 = vpop.permute.xlu1 %368  ;;  %v2408_v63 = vpop.permute.xlu0 %373 }
  0xbe   : > { %697 = vrot.lane.b32.xlu1 %v2146_v1, %s2059_s8  ;;  %785 = vrot.lane.b32.xlu0 %v2166_v5, %s2060_s22 }
  0xc1   : > { %v2417_v9 = vpop.permute.xlu1 %378  ;;  %v2419_v10 = vpop.permute.xlu0 %383 }
  0xc2   : > { %815 = vperm.xlu1 %1982, %v1872_v0   ;;  %861 = vrot.lane.b32.xlu0 %v2179_v8, %s2061_s29  ;;  %v274_v8 = vsel %vm259_vm0, 0.0, %v2336_v39 }
  0xc5   : > { %v2426_v12 = vpop.permute.xlu1 %402  ;;  %v2428_v13 = vpop.permute.xlu0 %404 }
  0xc6   : > { %902 = vperm.xlu1 %1982, %v1877_v11   ;;  %695 = vrot.lane.b32.xlu0 %v2159_v4, %s2059_s8 }
  0xc9   : > { %v2432_v14 = vpop.permute.xlu1 %406  ;;  %v2434_v15 = vpop.permute.xlu0 %408 }
  0xca   : > { %783 = vrot.lane.b32.xlu1 %v2169_v6, %s2060_s22  ;;  %859 = vrot.lane.b32.xlu0 %v2166_v5, %s2061_s29 }
  0xcd   : > { %v2440_v16 = vpop.permute.xlu1 %410  ;;  %v2442_v17 = vpop.permute.xlu0 %412 }
  0xce   : > { %781 = vrot.lane.b32.xlu1 %v2156_v3, %s2060_s22  ;;  %857 = vrot.lane.b32.xlu0 %v2169_v6, %s2061_s29 }
  0xd1   : > { %v2451_v19 = vpop.permute.xlu1 %414  ;;  %v2453_v20 = vpop.permute.xlu0 %416 }
  0xd2   : > { %897 = vperm.xlu1 %1982, %v1876_v18   ;;  %779 = vrot.lane.b32.xlu0 %v2146_v1, %s2060_s22  ;;  %v1888_v18 = vld [vmem:[%s3633_s3 + $0x40] sm:$0xff] }
  0xd5   : > { %v2457_v21 = vpop.permute.xlu1 %454  ;;  %v2459_v22 = vpop.permute.xlu0 %459 }
  0xd6   : > { %855 = vrot.lane.b32.xlu1 %v2156_v3, %s2061_s29  ;;  %777 = vrot.lane.b32.xlu0 %v2159_v4, %s2060_s22  ;;  %v1894_v3 = vld [vmem:[%s3633_s3 + $0x70] sm:$0xff] }
  0xd9   : > { %v2465_v23 = vpop.permute.xlu1 %464  ;;  %v2467_v24 = vpop.permute.xlu0 %469 }
  0xda   : > { %853 = vrot.lane.b32.xlu1 %v2146_v1, %s2061_s29  ;;  %775 = vrot.lane.b32.xlu0 %v2149_v2, %s2060_s22 }
  0xdd   : > { %v2473_v25 = vpop.permute.xlu1 %488  ;;  %v2475_v26 = vpop.permute.xlu0 %490 }
  0xde   : > { %851 = vrot.lane.b32.xlu1 %v2159_v4, %s2061_s29  ;;  %849 = vrot.lane.b32.xlu0 %v2149_v2, %s2061_s29 }
  0xe1   : > { %v2487_v31 = vpop.permute.xlu1 %492  ;;  %v2489_v32 = vpop.permute.xlu0 %494 }
  0xe2   : > { %1123 = vperm.xlu1 %1982, %v1117_v27   ;;  %1128 = vperm.xlu0 %1981, %v1118_v28   ;;  %v1889_v27 = vld [vmem:[%s3633_s3 + $0x48] sm:$0xff] }
  0xe5   : > { %v2497_v37 = vpop.permute.xlu1 %496  ;;  %v2499_v40 = vpop.permute.xlu0 %498 }
  0xe6   : > { %1133 = vperm.xlu1 %1982, %v1119_v33   ;;  %1138 = vperm.xlu0 %1981, %v1120_v34   ;;  %v1890_v34 = vld [vmem:[%s3633_s3 + $0x50] sm:$0xff] }
  0xe9   : > { %v2509_v48 = vpop.permute.xlu1 %500  ;;  %v2511_v51 = vpop.permute.xlu0 %502 }
  0xea   : > { %1196 = vperm.xlu1 %1982, %v1884_v44   ;;  %1201 = vperm.xlu0 %1981, %v1885_v45   ;;  %v1891_v44 = vld [vmem:[%s3633_s3 + $0x58] sm:$0xff] }
  0xed   : > { %v2519_v0 = vpop.permute.xlu1 %536  ;;  %v2521_v11 = vpop.permute.xlu0 %541 }
  0xee   : > { %3672 = vst [vmem:[#allocation12_spill] sm:$0xff] %v2519_v0  ;;  %3673 = vst [vmem:[#allocation13_spill] sm:$0xff] %v2521_v11  ;;  %1206 = vperm.xlu1 %1982, %v1886_v54   ;;  %1211 = vperm.xlu0 %1981, %v1887_v57   ;;  %v1892_v57 = vld [vmem:[%s3633_s3 + $0x60] sm:$0xff]  ;;  %v1910_v0 = vld [vmem:[%s3633_s3 + $0xf0] sm:$0xff] }
  0xf1   : > { %v2529_v28 = vpop.permute.xlu1 %546  ;;  %v2531_v33 = vpop.permute.xlu0 %551 }
  0xf2   : > { %3674 = vst [vmem:[#allocation14_spill] sm:$0xff] %v2529_v28  ;;  %1277 = vperm.xlu1 %1982, %v1888_v18   ;;  %1282 = vperm.xlu0 %1981, %v1889_v27   ;;  %v1893_v18 = vld [vmem:[%s3633_s3 + $0x68] sm:$0xff] }
  0xf5   : > { %v2539_v45 = vpop.permute.xlu1 %577  ;;  %v2541_v54 = vpop.permute.xlu0 %582 }
  0xf6   : > { %3675 = vst [vmem:[#allocation15_spill] sm:$0xff] %v2539_v45  ;;  %3676 = vst [vmem:[#allocation16_spill] sm:$0xff] %v2541_v54  ;;  %1287 = vperm.xlu1 %1982, %v1890_v34   ;;  %1292 = vperm.xlu0 %1981, %v1891_v44   ;;  %v1895_v34 = vld [vmem:[%s3633_s3 + $0x78] sm:$0xff]  ;;  %v1896_v54 = vld [vmem:[%s3633_s3 + $0x80] sm:$0xff] }
  0xf7   : > { %v1902_v45 = vld [vmem:[%s3633_s3 + $0xb0] sm:$0xff] }
  0xf9   : > { %v2549_v27 = vpop.permute.xlu1 %587  ;;  %v2551_v41 = vpop.permute.xlu0 %592 }
  0xfa   : > { %3677 = vst [vmem:[#allocation17_spill] sm:$0xff] %v2549_v27  ;;  %1358 = vperm.xlu1 %1982, %v1892_v57   ;;  %1363 = vperm.xlu0 %1981, %v1893_v18   ;;  %v1897_v57 = vld [vmem:[%s3633_s3 + $0x88] sm:$0xff] }
  0xfd   : > { %v2559_v44 = vpop.permute.xlu1 %611  ;;  %v2561_v4 = vpop.permute.xlu0 %613 }
  0xfe   : > { %3678 = vst [vmem:[#allocation18_spill] sm:$0xff] %v2559_v44  ;;  %3679 = vst [vmem:[#allocation19_spill] sm:$0xff] %v2561_v4  ;;  %1368 = vperm.xlu1 %1982, %v1894_v3   ;;  %1373 = vperm.xlu0 %1981, %v1895_v34   ;;  %v1898_v44 = vld [vmem:[%s3633_s3 + $0x90] sm:$0xff]  ;;  %v1899_v3 = vld [vmem:[%s3633_s3 + $0x98] sm:$0xff] }
 0x101   : > { %v2569_v18 = vpop.permute.xlu1 %615  ;;  %v2571_v1 = vpop.permute.xlu0 %617 }
 0x102   : > { %3680 = vst [vmem:[#allocation20_spill] sm:$0xff] %v2569_v18  ;;  %3681 = vst [vmem:[#allocation21_spill] sm:$0xff] %v2571_v1  ;;  %1399 = vperm.xlu1 %1982, %v1896_v54   ;;  %1404 = vperm.xlu0 %1981, %v1897_v57   ;;  %v1900_v18 = vld [vmem:[%s3633_s3 + $0xa0] sm:$0xff]  ;;  %v1901_v54 = vld [vmem:[%s3633_s3 + $0xa8] sm:$0xff] }
 0x105   : > { %v2579_v34 = vpop.permute.xlu1 %619  ;;  %v2581_v4 = vpop.permute.xlu0 %621 }
 0x106   : > { %3682 = vst [vmem:[#allocation22_spill] sm:$0xff] %v2579_v34  ;;  %3683 = vst [vmem:[#allocation23_spill] sm:$0xff] %v2581_v4  ;;  %1409 = vperm.xlu1 %1982, %v1898_v44   ;;  %1414 = vperm.xlu0 %1981, %v1899_v3   ;;  %v204_v44 = vlaneseq  ;;  %v1903_v3 = vld [vmem:[%s3633_s3 + $0xb8] sm:$0xff]  ;;  %v1905_v34 = vld [vmem:[%s3633_s3 + $0xc8] sm:$0xff] }
 0x109   : > { %v2589_v57 = vpop.permute.xlu1 %623  ;;  %v2591_v1 = vpop.permute.xlu0 %625 }
 0x10a   : > { %1480 = vperm.xlu1 %1982, %v1900_v18   ;;  %1485 = vperm.xlu0 %1981, %v1901_v54   ;;  %v1904_v18 = vld [vmem:[%s3633_s3 + $0xc0] sm:$0xff]  ;;  %v205_v54 = vand.u32 127, %v204_v44 }
 0x10c   : > { %v206_v4 = vadd.s32 128, %v205_v54  ;;  %v211_v11 = vand.u32 15, %v205_v54  ;;  %v273_v54 = vsel %vm259_vm0, 0.0, %v2309_v29 }
 0x10d   : > { %v2599_v2 = vpop.permute.xlu1 %659  ;;  %v2601_v6 = vpop.permute.xlu0 %664 }
 0x10e   : > { %3684 = vst [vmem:[#allocation24_spill] sm:$0xff] %v2599_v2  ;;  %3685 = vst [vmem:[#allocation25_spill] sm:$0xff] %v2601_v6  ;;  %1490 = vperm.xlu1 %1982, %v1902_v45   ;;  %1495 = vperm.xlu0 %1981, %v1903_v3   ;;  %v1906_v45 = vld [vmem:[%s3633_s3 + $0xd0] sm:$0xff]  ;;  %v1907_v3 = vld [vmem:[%s3633_s3 + $0xd8] sm:$0xff]  ;;  %v218_v6 = vand.u32 15, %v206_v4  ;;  %vm2637_vm2 = vcmp.ge.s32.totalorder %v211_v11, 1 }
 0x10f   : > { %vm2676_vm5 = vcmp.le.s32.totalorder %v211_v11, 14 }
 0x110   : > { %vm2633_vm1 = vcmp.ge.s32.totalorder %v218_v6, 1  ;;  %vm2688_vm6 = vcmp.le.s32.totalorder %v218_v6, 14  ;;  %v358_v6 = vsel %vm344_vm3, 0.0, %v2383_v55 }
 0x111   : > { %v2609_v27 = vpop.permute.xlu1 %669  ;;  %v2611_v5 = vpop.permute.xlu0 %674 }
 0x112   : > { %3686 = vst [vmem:[#allocation26_spill] sm:$0xff] %v2609_v27  ;;  %1561 = vperm.xlu1 %1982, %v1904_v18   ;;  %1566 = vperm.xlu0 %1981, %v1905_v34   ;;  %v1908_v34 = vld [vmem:[%s3633_s3 + $0xe0] sm:$0xff]  ;;  %v1909_v18 = vld [vmem:[%s3633_s3 + $0xe8] sm:$0xff] }
 0x115   : > { %v2619_v44 = vpop.permute.xlu1 %693  ;;  %v2621_v2 = vpop.permute.xlu0 %756 }
 0x116   : > { %3687 = vst [vmem:[#allocation27_spill] sm:$0xff] %v2619_v44  ;;  %1571 = vperm.xlu1 %1982, %v1906_v45   ;;  %1576 = vperm.xlu0 %1981, %v1907_v3   ;;  %v272_v45 = vsel %vm259_vm0, 0.0, %v2311_v30  ;;  %v261_v3 = vsel %vm259_vm0, %v2309_v29, %v2325_v35  ;;  %v263_v29 = vsel %vm259_vm0, %v2346_v43, %v2344_v42  ;;  %v275_v35 = vsel %vm259_vm0, 0.0, %v2346_v43 }
 0x117   : > { %v280_v42 = vsel %vm2637_vm2, %v272_v45, 0.0 }
 0x118   : > { %v312_v45 = vmul.f32 %v2360_v47, %v280_v42 }
 0x119   : > { %v2629_v27 = vpop.permute.xlu1 %751  ;;  %v2631_v28 = vpop.permute.xlu0 %830 }
 0x11a   : > { %3688 = vst [vmem:[#allocation28_spill] sm:$0xff] %v2629_v27  ;;  %3689 = vst [vmem:[#allocation29_spill] sm:$0xff] %v2631_v28  ;;  %1634 = vperm.xlu1 %1982, %v1908_v34   ;;  %v260_v27 = vsel %vm259_vm0, %v2311_v30, %v2327_v36  ;;  %1639 = vperm.xlu0 %1981, %v1909_v18   ;;  %v262_v34 = vsel %vm259_vm0, %v2336_v39, %v2334_v38  ;;  %v283_v18 = vsel %vm2633_vm1, %v261_v3, 0.0 }
 0x11b   : > { %v281_v38 = vsel %vm2633_vm1, %v260_v27, 0.0  ;;  %v282_v39 = vsel %vm2637_vm2, %v273_v54, 0.0  ;;  %v284_v28 = vsel %vm2637_vm2, %v274_v8, 0.0  ;;  %v285_v3 = vsel %vm2633_vm1, %v262_v34, 0.0 }
 0x11c   : > { %v286_v27 = vsel %vm2637_vm2, %v275_v35, 0.0  ;;  %v287_v54 = vsel %vm2633_vm1, %v263_v29, 0.0  ;;  %v314_v11 = vmul.f32 %v2358_v46, %v282_v39  ;;  %v313_v8 = vmul.f32 %v2360_v47, %v281_v38 }
 0x11d   : > { %v2664_v30 = vpop.permute.xlu1 %707  ;;  %v2666_v36 = vpop.permute.xlu0 %705  ;;  %v357_v34 = vsel %vm344_vm3, 0.0, %v2374_v52  ;;  %v345_v29 = vsel %vm344_vm3, %v2374_v52, %v2376_v53  ;;  %v346_v35 = vsel %vm344_vm3, %v2383_v55, %v2385_v56  ;;  %v359_v47 = vsel %vm344_vm3, 0.0, %v2392_v58 }
 0x11e   : > { %3694 = vst [vmem:[#allocation30_spill] sm:$0xff] %v2666_v36  ;;  %1644 = vperm.xlu1 %1982, %v1910_v0   ;;  %v315_v0 = vmul.f32 %v2358_v46, %v283_v18  ;;  %v386_v18 = vmul.f32 %v2406_v62, %v357_v34  ;;  %v387_v38 = vmul.f32 %v2406_v62, %v345_v29  ;;  %v360_v55 = vsel %vm344_vm3, 0.0, %v2398_v60 }
 0x11f   : > { %v388_v39 = vmul.f32 %v2408_v63, %v358_v6  ;;  %v347_v53 = vsel %vm344_vm3, %v2392_v58, %v2394_v59  ;;  %v348_v56 = vsel %vm344_vm3, %v2398_v60, %v2400_v61  ;;  %v389_v42 = vmul.f32 %v2408_v63, %v346_v35 }
 0x120   : > { %v390_v62 = vmul.f32 %v2417_v9, %v359_v47  ;;  %v391_v34 = vmul.f32 %v2417_v9, %v347_v53  ;;  %v392_v29 = vmul.f32 %v2419_v10, %v360_v55  ;;  %v393_v6 = vmul.f32 %v2419_v10, %v348_v56 }
 0x121   : > { %v2706_v46 = vpop.permute.xlu1 %746  ;;  %v2713_v52 = vpop.permute.xlu0 %825  ;;  %v316_v58 = vmul.f32 %v2365_v49, %v284_v28  ;;  %v317_v59 = vmul.f32 %v2365_v49, %v285_v3  ;;  %v394_v61 = vadd.f32 %v386_v18, %v312_v45  ;;  %v395_v63 = vadd.f32 %v387_v38, %v313_v8 }
 0x122   : > { %3699 = vst [vmem:[#allocation31_spill] sm:$0xff] %v2706_v46  ;;  %3700 = vst [vmem:[#allocation32_spill] sm:$0xff] %v2713_v52  ;;  %v318_v46 = vmul.f32 %v2367_v50, %v286_v27  ;;  %v319_v52 = vmul.f32 %v2367_v50, %v287_v54  ;;  %v396_v35 = vadd.f32 %v388_v39, %v314_v11  ;;  %v431_v9 = vsel %vm418_vm4, 0.0, %v2426_v12 }
 0x123   : > { %v397_v10 = vadd.f32 %v389_v42, %v315_v0  ;;  %v419_v28 = vsel %vm418_vm4, %v2426_v12, %v2428_v13  ;;  %v432_v49 = vsel %vm418_vm4, 0.0, %v2432_v14  ;;  %v422_v50 = vsel %vm418_vm4, %v2451_v19, %v2453_v20 }
 0x124   : > { %v398_v3 = vadd.f32 %v390_v62, %v316_v58  ;;  %v399_v27 = vadd.f32 %v391_v34, %v317_v59  ;;  %v400_v54 = vadd.f32 %v392_v29, %v318_v46  ;;  %v401_v11 = vadd.f32 %v393_v6, %v319_v52 }
 0x125   : > { %v2732_v60 = vpop.permute.xlu1 %912  ;;  %v2736_v47 = vpop.permute.xlu0 %703  ;;  %v420_v0 = vsel %vm418_vm4, %v2432_v14, %v2434_v15  ;;  %v433_v45 = vsel %vm418_vm4, 0.0, %v2440_v16  ;;  %v439_v12 = vsel %vm2676_vm5, %v431_v9, 0.0  ;;  %v508_v13 = vsel %vm504_vm7, %v2509_v48, %v2511_v51 }
 0x126   : > { %v440_v8 = vsel %vm2688_vm6, %v419_v28, 0.0  ;;  %v446_v46 = vsel %vm2688_vm6, %v422_v50, 0.0  ;;  %v472_v14 = vmul.f32 %v2457_v21, %v439_v12  ;;  %v441_v15 = vsel %vm2676_vm5, %v432_v49, 0.0 }
 0x127   : > { %v421_v38 = vsel %vm418_vm4, %v2440_v16, %v2442_v17  ;;  %v434_v51 = vsel %vm418_vm4, 0.0, %v2451_v19  ;;  %v473_v39 = vmul.f32 %v2457_v21, %v440_v8  ;;  %v479_v52 = vmul.f32 %v2467_v24, %v446_v46 }
 0x128   : > { %v442_v53 = vsel %vm2688_vm6, %v420_v0, 0.0  ;;  %v474_v55 = vmul.f32 %v2459_v22, %v441_v15  ;;  %v443_v56 = vsel %vm2676_vm5, %v433_v45, 0.0  ;;  %v528_v42 = vsel %vm2633_vm1, %v508_v13, 0.0 }
 0x129   : > { %v2756_v20 = vpop.permute.xlu1 %701  ;;  %v2765_v18 = vpop.permute.xlu0 %741  ;;  %v475_v16 = vmul.f32 %v2459_v22, %v442_v53  ;;  %v561_v17 = vmul.f32 %v2531_v33, %v528_v42  ;;  %v643_v19 = vsel %vm627_vm9, %v2591_v1, 0.0  ;;  %v725_v21 = vsel %vm709_vm8, %v2664_v30, 0.0  ;;  %v3702_v53 = vld [vmem:[#allocation29_spill] sm:$0xff] }
 0x12a   : > { %v444_v34 = vsel %vm2688_vm6, %v421_v38, 0.0  ;;  %v2789_v29 = vadd.f32 %v472_v14, %v394_v61  ;;  %v476_v6 = vmul.f32 %v2465_v23, %v443_v56  ;;  %v445_v58 = vsel %vm2676_vm5, %v434_v51, 0.0 }
 0x12b   : > { %v2796_v59 = vadd.f32 %v473_v39, %v395_v63  ;;  %v477_v9 = vmul.f32 %v2465_v23, %v444_v34  ;;  %v487_v28 = vadd.f32 %v479_v52, %v401_v11  ;;  %v602_v49 = vmul.f32 %v2551_v41, %v2176_v7 }
 0x12c   : > { %v478_v50 = vmul.f32 %v2467_v24, %v445_v58  ;;  %v520_v61 = vsel %vm504_vm7, 0.0, %v2509_v48  ;;  %v651_v0 = vsel %vm2688_vm6, %v643_v19, 0.0  ;;  %v733_v45 = vsel %vm2633_vm1, %v725_v21, 0.0 }
 0x12d   : > { %v790_v62 = vpop.permute.xlu1 %789  ;;  %v2794_v22 = vpop.permute.xlu0 %820  ;;  %v2808_v12 = vadd.f32 %v474_v55, %v396_v35  ;;  %v2810_v63 = vadd.f32 %v475_v16, %v397_v10  ;;  %v569_v23 = vadd.f32 %v561_v17, %v487_v28  ;;  %v684_v11 = vmul.f32 %v2611_v5, %v651_v0  ;;  %v3704_v28 = vld [vmem:[#allocation12_spill] sm:$0xff] }
 0x12e   : > { %v2815_v7 = vadd.f32 %v476_v6, %v398_v3  ;;  %v517_v24 = vsel %vm504_vm7, 0.0, %v2473_v25  ;;  %v505_v48 = vsel %vm504_vm7, %v2473_v25, %v2475_v26  ;;  %v807_v8 = vsel %vm791_vm10, %v790_v62, 0.0 }
 0x12f   : > { %v506_v10 = vsel %vm504_vm7, %v2487_v31, %v2489_v32  ;;  %v527_v46 = vsel %vm2637_vm2, %v520_v61, 0.0  ;;  %v610_v3 = vadd.f32 %v602_v49, %v569_v23  ;;  %v766_v14 = vmul.f32 %v2621_v2, %v733_v45  ;;  %v3701_v32 = vld [vmem:[#allocation30_spill] sm:$0xff] }
 0x130   : > { %v485_v15 = vadd.f32 %v477_v9, %v399_v27  ;;  %v486_v38 = vadd.f32 %v478_v50, %v400_v54  ;;  %v507_v25 = vsel %vm504_vm7, %v2497_v37, %v2499_v40  ;;  %v560_v26 = vmul.f32 %v2531_v33, %v527_v46  ;;  %v3705_v61 = vld [vmem:[#allocation14_spill] sm:$0xff] }
 0x131   : > { %v2813_v13 = vpop.permute.xlu1 %907  ;;  %v2823_v35 = vpop.permute.xlu0 %699  ;;  %v631_v51 = vsel %vm627_vm9, %v2589_v57, %v2591_v1  ;;  %v692_v39 = vadd.f32 %v684_v11, %v610_v3  ;;  %v713_v52 = vsel %vm709_vm8, %v3701_v32, %v2664_v30  ;;  %v840_v55 = vmul.f32 %v3702_v53, %v807_v8  ;;  %v3703_v30 = vld [vmem:[#allocation11_spill] sm:$0xff] }
 0x132   : > { %v522_v27 = vsel %vm2633_vm1, %v505_v48, 0.0  ;;  %v518_v40 = vsel %vm504_vm7, 0.0, %v2487_v31  ;;  %v524_v33 = vsel %vm2633_vm1, %v506_v10, 0.0  ;;  %v521_v1 = vsel %vm2637_vm2, %v517_v24, 0.0  ;;  %v3706_v10 = vld [vmem:[#allocation13_spill] sm:$0xff] }
 0x133   : > { %v519_v54 = vsel %vm504_vm7, 0.0, %v2497_v37  ;;  %v601_v42 = vmul.f32 %v2551_v41, %v3703_v30  ;;  %v774_v17 = vadd.f32 %v766_v14, %v692_v39  ;;  %v526_v19 = vsel %vm2633_vm1, %v507_v25, 0.0  ;;  %v3707_v14 = vld [vmem:[#allocation23_spill] sm:$0xff]  ;;  %v3710_v30 = vld [vmem:[#allocation22_spill] sm:$0xff] }
 0x134   : > { %v650_v31 = vsel %vm2676_vm5, %v631_v51, 0.0  ;;  %v732_v21 = vsel %vm2637_vm2, %v713_v52, 0.0  ;;  %v568_v6 = vadd.f32 %v560_v26, %v486_v38  ;;  %v554_v49 = vmul.f32 %v3704_v28, %v521_v1 }
 0x135   : > { %v788_v56 = vpop.permute.xlu1 %787  ;;  %v864_v57 = vpop.permute.xlu0 %863  ;;  %v683_v37 = vmul.f32 %v2611_v5, %v650_v31  ;;  %v848_v41 = vadd.f32 %v840_v55, %v774_v17  ;;  %v523_v50 = vsel %vm2637_vm2, %v518_v40, 0.0  ;;  %v559_v0 = vmul.f32 %v3705_v61, %v526_v19  ;;  %v3708_v55 = vld [vmem:[#allocation9_spill] sm:$0xff] }
 0x136   : > { %v881_v16 = vsel %vm865_vm11, %v864_v57, 0.0  ;;  %v795_v45 = vsel %vm791_vm10, %v788_v56, %v790_v62  ;;  %v525_v11 = vsel %vm2637_vm2, %v519_v54, 0.0  ;;  %v609_v24 = vadd.f32 %v601_v42, %v568_v6  ;;  %v3709_v56 = vld [vmem:[#allocation17_spill] sm:$0xff] }
 0x137   : > { %v889_v34 = vsel %vm2688_vm6, %v881_v16, 0.0  ;;  %v765_v5 = vmul.f32 %v2621_v2, %v732_v21  ;;  %v555_v8 = vmul.f32 %v3704_v28, %v522_v27  ;;  %v556_v46 = vmul.f32 %v3706_v10, %v523_v50 }
 0x138   : > { %v922_v9 = vmul.f32 %v2732_v60, %v889_v34  ;;  %v557_v3 = vmul.f32 %v3706_v10, %v524_v33  ;;  %v642_v38 = vsel %vm627_vm9, %v3707_v14, 0.0  ;;  %v691_v25 = vadd.f32 %v683_v37, %v609_v24  ;;  %v3712_v37 = vld [vmem:[#allocation10_spill] sm:$0xff] }
 0x139   : > { %v2864_v58 = vpop.permute.xlu1 %697  ;;  %v786_v23 = vpop.permute.xlu0 %785  ;;  %v724_v62 = vsel %vm709_vm8, %v2736_v47, 0.0  ;;  %v839_v26 = vmul.f32 %v3702_v53, %v795_v45  ;;  %v2886_v2 = vadd.f32 %v554_v49, %v2789_v29  ;;  %v558_v32 = vmul.f32 %v3705_v61, %v525_v11  ;;  %v3711_v29 = vld [vmem:[#allocation26_spill] sm:$0xff]  ;;  %v3715_v11 = vld [vmem:[#allocation15_spill] sm:$0xff] }
 0x13a   : > { %v930_v48 = vadd.f32 %v922_v9, %v848_v41  ;;  %v567_v52 = vadd.f32 %v559_v0, %v485_v15  ;;  %v600_v27 = vmul.f32 %v3709_v56, %v3708_v55  ;;  %v649_v33 = vsel %vm2688_vm6, %v642_v38, 0.0  ;;  %v3714_v45 = vld [vmem:[#allocation6_spill] sm:$0xff]  ;;  %v3718_v38 = vld [vmem:[#allocation16_spill] sm:$0xff] }
 0x13b   : > { %v773_v1 = vadd.f32 %v765_v5, %v691_v25  ;;  %v630_v42 = vsel %vm627_vm9, %v3710_v30, %v3707_v14  ;;  %v682_v16 = vmul.f32 %v3711_v29, %v649_v33  ;;  %v731_v15 = vsel %vm2633_vm1, %v724_v62, 0.0  ;;  %v3717_v14 = vld [vmem:[#allocation5_spill] sm:$0xff] }
 0x13c   : > { %v938_v39 = vmax.f32 %v930_v48, 0.0  ;;  %v712_v19 = vsel %vm709_vm8, %v2756_v20, %v2736_v47  ;;  %v2909_v34 = vadd.f32 %v555_v8, %v2796_v59  ;;  %v564_v6 = vadd.f32 %v556_v46, %v2808_v12  ;;  %v3713_v20 = vld [vmem:[#allocation28_spill] sm:$0xff] }
 0x13d   : > { %v2883_v51 = vpop.permute.xlu1 %815  ;;  %v862_v40 = vpop.permute.xlu0 %861  ;;  %v847_v21 = vadd.f32 %v839_v26, %v773_v1  ;;  %v599_v41 = vmul.f32 %v3709_v56, %v3712_v37  ;;  %v806_v9 = vsel %vm791_vm10, %v786_v23, 0.0  ;;  %v608_v47 = vadd.f32 %v600_v27, %v567_v52  ;;  %v3716_v48 = vld [vmem:[#allocation32_spill] sm:$0xff] }
 0x13e   : > { %v869_v54 = vsel %vm865_vm11, %v862_v40, %v864_v57  ;;  %v946_v53 = vmin.f32 %v938_v39, 6.0  ;;  %v764_v49 = vmul.f32 %v3713_v20, %v731_v15  ;;  %v565_v61 = vadd.f32 %v557_v3, %v2810_v63  ;;  %v3719_v3 = vld [vmem:[#allocation21_spill] sm:$0xff]  ;;  %v3720_v56 = vld [vmem:[#allocation8_spill] sm:$0xff] }
 0x13f   : > { %v888_v17 = vsel %vm2676_vm5, %v869_v54, 0.0  ;;  %v566_v59 = vadd.f32 %v558_v32, %v2815_v7  ;;  %v730_v0 = vsel %vm2637_vm2, %v712_v19, 0.0  ;;  %v2927_v24 = vmul.f32 %v3715_v11, %v3714_v45  ;;  %v3722_v15 = vld [vmem:[#allocation20_spill] sm:$0xff] }
 0x140   : > { %v921_v31 = vmul.f32 %v2732_v60, %v888_v17  ;;  %988 = vmatprep.subr.mxu0 %v946_v53  ;;  %1923 = vmatprep.subr.mxu1 %v946_v53  ;;  %v648_v60 = vsel %vm2676_vm5, %v630_v42, 0.0  ;;  %v690_v5 = vadd.f32 %v682_v16, %v608_v47  ;;  %v838_v8 = vmul.f32 %v3716_v48, %v806_v9  ;;  %v3721_v42 = vld [vmem:[#allocation7_spill] sm:$0xff] }
 0x141   : > { %v2906_v57 = vpop.permute.xlu1 %902  ;;  %v2915_v28 = vpop.permute.xlu0 %695  ;;  %v681_v12 = vmul.f32 %v3711_v29, %v648_v60  ;;  %v597_v25 = vmul.f32 %v3718_v38, %v3717_v14  ;;  %v607_v63 = vadd.f32 %v599_v41, %v566_v59  ;;  %v641_v7 = vsel %vm627_vm9, %v3719_v3, 0.0  ;;  %v3723_v47 = vld [vmem:[#allocation19_spill] sm:$0xff]  ;;  %v3724_v60 = vld [vmem:[#allocation18_spill] sm:$0xff] }
 0x142   : > { %v929_v50 = vadd.f32 %v921_v31, %v847_v21  ;;  %v772_v39 = vadd.f32 %v764_v49, %v690_v5  ;;  %v763_v32 = vmul.f32 %v3713_v20, %v730_v0  ;;  %v596_v27 = vmul.f32 %v3715_v11, %v3720_v56  ;;  %v3728_v56 = vld [vmem:[#allocation24_spill] sm:$0xff] }
 0x143   : > { %v689_v40 = vadd.f32 %v681_v12, %v607_v63  ;;  %v723_v33 = vsel %vm709_vm8, %v2823_v35, 0.0  ;;  %v598_v29 = vmul.f32 %v3718_v38, %v3721_v42  ;;  %v605_v16 = vadd.f32 %v597_v25, %v564_v6  ;;  %v3725_v6 = vld [vmem:[#allocation25_spill] sm:$0xff] }
 0x144   : > { %v937_v46 = vmax.f32 %v929_v50, 0.0  ;;  %v846_v54 = vadd.f32 %v838_v8, %v772_v39  ;;  %v629_v17 = vsel %vm627_vm9, %v3722_v15, %v3719_v3  ;;  %v647_v19 = vsel %vm2688_vm6, %v641_v7, 0.0 }
 0x145   : > { %v784_v10 = vpop.permute.xlu1 %783  ;;  %v860_v26 = vpop.permute.xlu0 %859  ;;  %v771_v21 = vadd.f32 %v763_v32, %v689_v40  ;;  %v729_v37 = vsel %vm2633_vm1, %v723_v33, 0.0  ;;  %v628_v20 = vsel %vm627_vm9, %v3724_v60, %v3723_v47  ;;  %v680_v49 = vmul.f32 %v3725_v6, %v647_v19 }
 0x146   : > { %v794_v62 = vsel %vm791_vm10, %v784_v10, %v786_v23  ;;  %v880_v52 = vsel %vm865_vm11, %v860_v26, 0.0  ;;  %v945_v55 = vmin.f32 %v937_v46, 6.0  ;;  %v711_v50 = vsel %vm709_vm8, %v2864_v58, %v2823_v35  ;;  %v3726_v46 = vld [vmem:[#allocation31_spill] sm:$0xff] }
 0x147   : > { %v887_v1 = vsel %vm2688_vm6, %v880_v52, 0.0  ;;  %v837_v23 = vmul.f32 %v3716_v48, %v794_v62  ;;  %v606_v48 = vadd.f32 %v598_v29, %v565_v61  ;;  %v640_v8 = vsel %vm627_vm9, %v3723_v47, 0.0 }
 0x148   : > { %v920_v53 = vmul.f32 %v2813_v13, %v887_v1  ;;  %989 = vmatpush1.msra.mxu0 %v945_v55  ;;  %1927 = vmatpush1.msra.mxu1 %v945_v55  ;;  %v646_v10 = vsel %vm2676_vm5, %v629_v17, 0.0  ;;  %v762_v35 = vmul.f32 %v3726_v46, %v729_v37  ;;  %v728_v38 = vsel %vm2637_vm2, %v711_v50, 0.0 }
 0x149   : > { %v782_v30 = vpop.permute.xlu1 %781  ;;  %v858_v31 = vpop.permute.xlu0 %857  ;;  %v845_v12 = vadd.f32 %v837_v23, %v771_v21  ;;  %v679_v14 = vmul.f32 %v3725_v6, %v646_v10  ;;  %v644_v63 = vsel %vm2676_vm5, %v628_v20, 0.0  ;;  %v688_v61 = vadd.f32 %v680_v49, %v606_v48 }
 0x14a   : > { %v868_v41 = vsel %vm865_vm11, %v858_v31, %v860_v26  ;;  %v928_v9 = vadd.f32 %v920_v53, %v846_v54  ;;  %v805_v0 = vsel %vm791_vm10, %v782_v30, 0.0  ;;  %v722_v3 = vsel %vm709_vm8, %v2915_v28, 0.0  ;;  %v3727_v26 = vld [vmem:[#allocation27_spill] sm:$0xff] }
 0x14b   : > { %v886_v59 = vsel %vm2676_vm5, %v868_v41, 0.0  ;;  %v836_v7 = vmul.f32 %v2794_v22, %v805_v0  ;;  %v645_v62 = vsel %vm2688_vm6, %v640_v8, 0.0  ;;  %v710_v39 = vsel %vm709_vm8, %v3727_v26, %v2915_v28 }
 0x14c   : > { %v919_v45 = vmul.f32 %v2813_v13, %v886_v59  ;;  %v936_v5 = vmax.f32 %v928_v9, 0.0  ;;  %v678_v40 = vmul.f32 %v3728_v56, %v645_v62  ;;  %v770_v33 = vadd.f32 %v762_v35, %v688_v61 }
 0x14d   : > { %v2966_v11 = vpop.permute.xlu1 %897  ;;  %v780_v58 = vpop.permute.xlu0 %779  ;;  %v761_v1 = vmul.f32 %v3726_v46, %v728_v38  ;;  %v687_v53 = vadd.f32 %v679_v14, %v605_v16  ;;  %v727_v42 = vsel %vm2633_vm1, %v722_v3, 0.0  ;;  %v726_v29 = vsel %vm2637_vm2, %v710_v39, 0.0 }
 0x14e   : > { %v944_v25 = vmin.f32 %v936_v5, 6.0  ;;  %v927_v13 = vadd.f32 %v919_v45, %v845_v12  ;;  %v793_v32 = vsel %vm791_vm10, %v780_v58, %v782_v30  ;;  %v844_v15 = vadd.f32 %v836_v7, %v770_v33 }
 0x14f   : > { %v835_v17 = vmul.f32 %v2794_v22, %v793_v32  ;;  %v603_v31 = vadd.f32 %v2927_v24, %v2886_v2  ;;  %v604_v16 = vadd.f32 %v596_v27, %v2909_v34  ;;  %v677_v21 = vmul.f32 %v3728_v56, %v644_v63  ;;  %v947_v32 = vld [vmem:[%s3632_s2] sm:$0xff]  ;;  %v950_v56 = vld [vmem:[%s3632_s2 + $0x18] sm:$0xff] }
 0x150   : > { %990 = vmatprep.subr.mxu0 %v944_v25  ;;  %1924 = vmatprep.subr.mxu1 %v944_v25  ;;  %v935_v55 = vmax.f32 %v927_v13, 0.0  ;;  %v769_v9 = vadd.f32 %v761_v1, %v687_v53  ;;  %v760_v47 = vmul.f32 %v2765_v18, %v727_v42  ;;  %v759_v49 = vmul.f32 %v2765_v18, %v726_v29 }
 0x151   : > { %v856_v52 = vpop.permute.xlu1 %855  ;;  %v778_v23 = vpop.permute.xlu0 %777  ;;  %v686_v6 = vadd.f32 %v678_v40, %v604_v16  ;;  %v685_v12 = vadd.f32 %v677_v21, %v603_v31 }
 0x152   : > { %v879_v54 = vsel %vm865_vm11, %v856_v52, 0.0  ;;  %v943_v30 = vmin.f32 %v935_v55, 6.0  ;;  %v804_v37 = vsel %vm791_vm10, %v778_v23, 0.0  ;;  %v843_v24 = vadd.f32 %v835_v17, %v769_v9  ;;  %v948_v55 = vld [vmem:[%s3632_s2 + $0x8] sm:$0xff] }
 0x153   : > { %v885_v28 = vsel %vm2688_vm6, %v879_v54, 0.0  ;;  %v834_v27 = vmul.f32 %v2883_v51, %v804_v37  ;;  %v768_v5 = vadd.f32 %v760_v47, %v686_v6  ;;  %v767_v46 = vadd.f32 %v759_v49, %v685_v12 }
 0x154   : > { %v918_v19 = vmul.f32 %v2906_v57, %v885_v28  ;;  %991 = vmatpush1.msra.mxu0 %v943_v30  ;;  %1928 = vmatpush1.msra.mxu1 %v943_v30 }
 0x155   : > { %v854_v41 = vpop.permute.xlu1 %853  ;;  %v776_v22 = vpop.permute.xlu0 %775  ;;  %v842_v14 = vadd.f32 %v834_v27, %v768_v5 }
 0x156   : > { %v867_v60 = vsel %vm865_vm11, %v854_v41, %v856_v52  ;;  %v926_v20 = vadd.f32 %v918_v19, %v844_v15  ;;  %v792_v34 = vsel %vm791_vm10, %v776_v22, %v778_v23  ;;  %v949_v52 = vld [vmem:[%s3632_s2 + $0x10] sm:$0xff] }
 0x157   : > { %v884_v2 = vsel %vm2676_vm5, %v867_v60, 0.0  ;;  %v833_v0 = vmul.f32 %v2883_v51, %v792_v34 }
 0x158   : > { %v917_v50 = vmul.f32 %v2906_v57, %v884_v2  ;;  %v934_v59 = vmax.f32 %v926_v20, 0.0 }
 0x159   : > { %v852_v45 = vpop.permute.xlu1 %851  ;;  %v850_v8 = vpop.permute.xlu0 %849  ;;  %v841_v25 = vadd.f32 %v833_v0, %v767_v46 }
 0x15a   : > { %v878_v48 = vsel %vm865_vm11, %v852_v45, 0.0  ;;  %v942_v18 = vmin.f32 %v934_v59, 6.0  ;;  %v925_v10 = vadd.f32 %v917_v50, %v843_v24  ;;  %v866_v58 = vsel %vm865_vm11, %v850_v8, %v852_v45 }
 0x15b   : > { %v883_v35 = vsel %vm2688_vm6, %v878_v48, 0.0  ;;  %v882_v38 = vsel %vm2676_vm5, %v866_v58, 0.0 }
 0x15c   : > { %v916_v57 = vmul.f32 %v2966_v11, %v883_v35  ;;  %992 = vmatprep.subr.mxu0 %v942_v18  ;;  %1925 = vmatprep.subr.mxu1 %v942_v18  ;;  %v933_v51 = vmax.f32 %v925_v10, 0.0  ;;  %v915_v13 = vmul.f32 %v2966_v11, %v882_v38  ;;  %v3729_v11 = vmov 0.0  }
 0x15d   : > { %v3062_v19 = vpop.permute.xlu1 %1123  ;;  %v3074_v16 = vpop.permute.xlu0 %1128 }
 0x15e   : > { %v941_v63 = vmin.f32 %v933_v51, 6.0  ;;  %v924_v61 = vadd.f32 %v916_v57, %v842_v14  ;;  %v923_v3 = vadd.f32 %v915_v13, %v841_v25 }
 0x160   : > { %993 = vmatpush1.msra.mxu0 %v941_v63  ;;  %1929 = vmatpush1.msra.mxu1 %v941_v63  ;;  %v932_v7 = vmax.f32 %v924_v61, 0.0  ;;  %v931_v62 = vmax.f32 %v923_v3, 0.0  ;;  %v1912_v63 = vld [vmem:[%s3633_s3 + $0x100] sm:$0xff]  ;;  %v1911_v3 = vld [vmem:[%s3633_s3 + $0xf8] sm:$0xff] }
 0x161   : > { %v3070_v31 = vpop.permute.xlu1 %1133  ;;  %v3084_v37 = vpop.permute.xlu0 %1138 }
 0x162   : > { %v940_v26 = vmin.f32 %v932_v7, 6.0  ;;  %v939_v39 = vmin.f32 %v931_v62, 6.0  ;;  %v1914_v7 = vld [vmem:[%s3633_s3 + $0x110] sm:$0xff] }
 0x164   : > { %994 = vmatprep.subr.mxu0 %v940_v26  ;;  %1926 = vmatprep.subr.mxu1 %v940_v26  ;;  %v1913_v26 = vld [vmem:[%s3633_s3 + $0x108] sm:$0xff] }
 0x165   : > { %995 = vmatpush1.msra.mxu0 %v939_v39  ;;  %1930 = vmatpush1.msra.mxu1 %v939_v39  ;;  %v3080_v21 = vpop.permute.xlu1 %1196  ;;  %v3094_v47 = vpop.permute.xlu0 %1201 }
 0x166   : > { %1880 = vmatmul.mubr.msk.f32.vlgmr.msra.gmra.mxu0 %vm951_vm12, %v947_v32  ;;  %1882 = vmatmul.mubr.msk.f32.vlgmr.msra.gmra.mxu1 %vm951_vm12, %v949_v52  ;;  %v1915_v32 = vld [vmem:[%s3633_s3 + $0x118] sm:$0xff] }
 0x167   : > { %1034 = vmatprep.mubr.f32.mxu0 %v3729_v11  ;;  %1046 = vmatprep.mubr.f32.mxu1 %v3729_v11 }
 0x169   : > { %v3090_v9 = vpop.permute.xlu1 %1206  ;;  %v3104_v34 = vpop.permute.xlu0 %1211 }
 0x16a   : > { %1881 = vmatmul.mubr.msk.f32.gmra.mxu0 %vm951_vm12, %v948_v55  ;;  %1883 = vmatmul.mubr.msk.f32.gmra.mxu1 %vm951_vm12, %v950_v56 }
 0x16d   : > { %v3100_v6 = vpop.permute.xlu1 %1277  ;;  %v3120_v45 = vpop.permute.xlu0 %1282 }
 0x171   : > { %v3114_v12 = vpop.permute.xlu1 %1287  ;;  %v3132_v8 = vpop.permute.xlu0 %1292 }
 0x175   : > { %v3128_v48 = vpop.permute.xlu1 %1358  ;;  %v3142_v10 = vpop.permute.xlu0 %1363 }
 0x179   : > { %v3138_v18 = vpop.permute.xlu1 %1368  ;;  %v3152_v35 = vpop.permute.xlu0 %1373 }
 0x17d   : > { %v3148_v46 = vpop.permute.xlu1 %1399  ;;  %v3162_v14 = vpop.permute.xlu0 %1404 }
 0x181   : > { %v3158_v58 = vpop.permute.xlu1 %1409  ;;  %v3172_v38 = vpop.permute.xlu0 %1414 }
 0x185   : > { %v3168_v57 = vpop.permute.xlu1 %1480  ;;  %v3182_v25 = vpop.permute.xlu0 %1485 }
 0x189   : > { %v3178_v51 = vpop.permute.xlu1 %1490  ;;  %v3195_v61 = vpop.permute.xlu0 %1495 }
 0x18d   : > { %v3188_v13 = vpop.permute.xlu1 %1561  ;;  %v3210_v39 = vpop.permute.xlu0 %1566 }
 0x191   : > { %v3205_v62 = vpop.permute.xlu1 %1571  ;;  %v3219_v11 = vpop.permute.xlu0 %1576 }
 0x195   : > { %v3215_v52 = vpop.permute.xlu1 %1634  ;;  %v3227_v56 = vpop.permute.xlu0 %1639 }
 0x199   : > { %v3223_v55 = vpop.permute.xlu1 %1644 }
 0x226   : > { %v1030_v40 = vpop.f32.mrf.mxu0  ;;  %v1042_v33 = vpop.f32.mrf.mxu1 }
 0x227   : > { %v1053_v1 = vmax.f32 %v1030_v40, 0.0  ;;  %v1057_v42 = vmax.f32 %v1042_v33, 0.0 }
 0x228   : > { %v1032_v54 = vpop.f32.mrf.mxu0  ;;  %v1044_v23 = vpop.f32.mrf.mxu1 }
 0x229   : > { %v3034_v53 = vmin.f32 %v1053_v1, 6.0  ;;  %v1054_v28 = vmax.f32 %v1032_v54, 0.0  ;;  %v1058_v29 = vmax.f32 %v1044_v23, 0.0  ;;  %v3040_v15 = vmin.f32 %v1057_v42, 6.0 }
 0x22a   : > { %v1036_v41 = vpop.f32.mrf.mxu0  ;;  %v1048_v60 = vpop.f32.mrf.mxu1 }
 0x22b   : > { %v3036_v30 = vmin.f32 %v1054_v28, 6.0  ;;  %1077 = vrot.lane.b32.xlu1 %v3034_v53, %s2054_s6  ;;  %v3044_v17 = vmin.f32 %v1058_v29, 6.0  ;;  %v1055_v20 = vmax.f32 %v1036_v41, 0.0  ;;  %v1059_v27 = vmax.f32 %v1048_v60, 0.0 }
 0x22c   : > { %v1038_v22 = vpop.f32.mrf.mxu0  ;;  %v1050_v2 = vpop.f32.mrf.mxu1 }
 0x22d   : > { %1079 = vrot.lane.b32.xlu0 %v3036_v30, %s2054_s6  ;;  %v1056_v49 = vmax.f32 %v1038_v22, 0.0  ;;  %v3106_v24 = vmin.f32 %v1055_v20, 6.0  ;;  %v1060_v59 = vmax.f32 %v1050_v2, 0.0  ;;  %v3116_v0 = vmin.f32 %v1059_v27, 6.0 }
 0x22f   : > { %1085 = vrot.lane.b32.xlu1 %v3040_v15, %s2054_s6  ;;  %v3110_v50 = vmin.f32 %v1056_v49, 6.0  ;;  %v3122_v5 = vmin.f32 %v1060_v59, 6.0 }
 0x231   : > { %1087 = vrot.lane.b32.xlu0 %v3044_v17, %s2054_s6 }
 0x233   : > { %1157 = vrot.lane.b32.xlu1 %v3034_v53, %s2055_s20 }
 0x235   : > { %1159 = vrot.lane.b32.xlu0 %v3036_v30, %s2055_s20 }
 0x237   : > { %1165 = vrot.lane.b32.xlu1 %v3040_v15, %s2055_s20 }
 0x239   : > { %1167 = vrot.lane.b32.xlu0 %v3044_v17, %s2055_s20 }
 0x23b   : > { %1230 = vrot.lane.b32.xlu1 %v3034_v53, %s2056_s9 }
 0x23d   : > { %1232 = vrot.lane.b32.xlu0 %v3036_v30, %s2056_s9 }
 0x23f   : > { %1238 = vrot.lane.b32.xlu1 %v3040_v15, %s2056_s9 }
 0x241   : > { %1240 = vrot.lane.b32.xlu0 %v3044_v17, %s2056_s9 }
 0x243   : > { %1311 = vrot.lane.b32.xlu1 %v3034_v53, %s2057_s28 }
 0x245   : > { %1313 = vrot.lane.b32.xlu0 %v3036_v30, %s2057_s28 }
 0x247   : > { %1319 = vrot.lane.b32.xlu1 %v3040_v15, %s2057_s28 }
 0x249   : > { %1321 = vrot.lane.b32.xlu0 %v3044_v17, %s2057_s28 }
 0x24b   : > { %1433 = vrot.lane.b32.xlu1 %v3034_v53, %s2058_s10 }
 0x24d   : > { %1435 = vrot.lane.b32.xlu0 %v3036_v30, %s2058_s10 }
 0x24f   : > { %1441 = vrot.lane.b32.xlu1 %v3040_v15, %s2058_s10 }
 0x251   : > { %1443 = vrot.lane.b32.xlu0 %v3044_v17, %s2058_s10 }
 0x253   : > { %1514 = vrot.lane.b32.xlu1 %v3034_v53, %s2059_s8 }
 0x255   : > { %1516 = vrot.lane.b32.xlu0 %v3036_v30, %s2059_s8 }
 0x257   : > { %1522 = vrot.lane.b32.xlu1 %v3040_v15, %s2059_s8 }
 0x259   : > { %1524 = vrot.lane.b32.xlu0 %v3044_v17, %s2059_s8 }
 0x25b   : > { %1081 = vrot.lane.b32.xlu1 %v3106_v24, %s2054_s6 }
 0x25d   : > { %1083 = vrot.lane.b32.xlu0 %v3110_v50, %s2054_s6 }
 0x25f   : > { %1089 = vrot.lane.b32.xlu1 %v3116_v0, %s2054_s6 }
 0x261   : > { %1091 = vrot.lane.b32.xlu0 %v3122_v5, %s2054_s6 }
 0x263   : > { %1161 = vrot.lane.b32.xlu1 %v3106_v24, %s2055_s20 }
 0x265   : > { %1163 = vrot.lane.b32.xlu0 %v3110_v50, %s2055_s20 }
 0x267   : > { %1169 = vrot.lane.b32.xlu1 %v3116_v0, %s2055_s20 }
 0x269   : > { %1171 = vrot.lane.b32.xlu0 %v3122_v5, %s2055_s20 }
 0x26b   : > { %1234 = vrot.lane.b32.xlu1 %v3106_v24, %s2056_s9 }
 0x26d   : > { %1236 = vrot.lane.b32.xlu0 %v3110_v50, %s2056_s9 }
 0x26f   : > { %1242 = vrot.lane.b32.xlu1 %v3116_v0, %s2056_s9 }
 0x271   : > { %1244 = vrot.lane.b32.xlu0 %v3122_v5, %s2056_s9 }
 0x273   : > { %1315 = vrot.lane.b32.xlu1 %v3106_v24, %s2057_s28 }
 0x275   : > { %1317 = vrot.lane.b32.xlu0 %v3110_v50, %s2057_s28 }
 0x277   : > { %1323 = vrot.lane.b32.xlu1 %v3116_v0, %s2057_s28 }
 0x279   : > { %1325 = vrot.lane.b32.xlu0 %v3122_v5, %s2057_s28  ;;  %s3579_s28 = scalar_lea.hbm %s3634_s4, %s1922_s11 }
 0x27b   : > { %1437 = vrot.lane.b32.xlu1 %v3106_v24, %s2058_s10 }
 0x27d   : > { %1439 = vrot.lane.b32.xlu0 %v3110_v50, %s2058_s10 }
 0x27f   : > { %1445 = vrot.lane.b32.xlu1 %v3116_v0, %s2058_s10 }
 0x281   : > { %1447 = vrot.lane.b32.xlu0 %v3122_v5, %s2058_s10 }
 0x283   : > { %1518 = vrot.lane.b32.xlu1 %v3106_v24, %s2059_s8 }
 0x285   : > { %1520 = vrot.lane.b32.xlu0 %v3110_v50, %s2059_s8 }
 0x287   : > { %1526 = vrot.lane.b32.xlu1 %v3116_v0, %s2059_s8 }
 0x289   : > { %1528 = vrot.lane.b32.xlu0 %v3122_v5, %s2059_s8 }
 0x28b   : > { %1715 = vperm.xlu1 %1982, %v1912_v63  }
 0x28d   : > { %1649 = vperm.xlu0 %1981, %v1911_v3  }
 0x28f   : > { %1725 = vperm.xlu1 %1982, %v1914_v7  }
 0x291   : > { %1720 = vperm.xlu0 %1981, %v1913_v26  }
 0x293   : > { %1595 = vrot.lane.b32.xlu1 %v3034_v53, %s2060_s22 }
 0x295   : > { %1730 = vperm.xlu0 %1981, %v1915_v32  }
 0x297   : > { %1599 = vrot.lane.b32.xlu1 %v3106_v24, %s2060_s22 }
 0x299   : > { %1597 = vrot.lane.b32.xlu0 %v3036_v30, %s2060_s22 }
 0x29b   : > { %1603 = vrot.lane.b32.xlu1 %v3040_v15, %s2060_s22 }
 0x29d   : > { %v1078_v40 = vpop.permute.xlu1 %1077  ;;  %1601 = vrot.lane.b32.xlu0 %v3110_v50, %s2060_s22 }
 0x29e   : > { %v1105_v54 = vsel %vm259_vm0, 0.0, %v1078_v40 }
 0x29f   : > { %1607 = vrot.lane.b32.xlu1 %v3116_v0, %s2060_s22  ;;  %v1080_v33 = vpop.permute.xlu0 %1079  ;;  %v1109_v28 = vsel %vm2637_vm2, %v1105_v54, 0.0 }
 0x2a0   : > { %v1093_v1 = vsel %vm259_vm0, %v1078_v40, %v1080_v33  ;;  %v1141_v49 = vmul.f32 %v3062_v19, %v1109_v28 }
 0x2a1   : > { %v1086_v23 = vpop.permute.xlu1 %1085  ;;  %1605 = vrot.lane.b32.xlu0 %v3044_v17, %s2060_s22  ;;  %v1110_v22 = vsel %vm2633_vm1, %v1093_v1, 0.0 }
 0x2a2   : > { %v1107_v41 = vsel %vm259_vm0, 0.0, %v1086_v23  ;;  %v1142_v3 = vmul.f32 %v3062_v19, %v1110_v22 }
 0x2a3   : > { %1668 = vrot.lane.b32.xlu1 %v3034_v53, %s2061_s29  ;;  %v1088_v42 = vpop.permute.xlu0 %1087  ;;  %v1113_v59 = vsel %vm2637_vm2, %v1107_v41, 0.0 }
 0x2a4   : > { %v1095_v29 = vsel %vm259_vm0, %v1086_v23, %v1088_v42  ;;  %v1145_v1 = vmul.f32 %v3070_v31, %v1113_v59 }
 0x2a5   : > { %v1158_v60 = vpop.permute.xlu1 %1157  ;;  %1609 = vrot.lane.b32.xlu0 %v3122_v5, %s2060_s22  ;;  %v1114_v40 = vsel %vm2633_vm1, %v1095_v29, 0.0  ;;  %s188_s22 = sand.u32 1, %s2043_s16  }
 0x2a6   : > { %v1185_v20 = vsel %vm344_vm3, 0.0, %v1158_v60  ;;  %v1146_v42 = vmul.f32 %v3070_v31, %v1114_v40  ;;  %s3589_s19 = scalar_lea.sflag [#allocation3], %s188_s22 }
 0x2a7   : > { %v1214_v2 = vmul.f32 %v3080_v21, %v1185_v20  ;;  %1672 = vrot.lane.b32.xlu1 %v3106_v24, %s2061_s29  ;;  %v1160_v27 = vpop.permute.xlu0 %1159 }
 0x2a8   : > { %v1173_v63 = vsel %vm344_vm3, %v1158_v60, %v1160_v27 }
 0x2a9   : > { %v1222_v7 = vadd.f32 %v1214_v2, %v1141_v49  ;;  %v1215_v26 = vmul.f32 %v3080_v21, %v1173_v63  ;;  %v1166_v32 = vpop.permute.xlu1 %1165  ;;  %1670 = vrot.lane.b32.xlu0 %v3036_v30, %s2061_s29 }
 0x2aa   : > { %v1187_v33 = vsel %vm344_vm3, 0.0, %v1166_v32 }
 0x2ab   : > { %v1223_v54 = vadd.f32 %v1215_v26, %v1142_v3  ;;  %v1218_v23 = vmul.f32 %v3090_v9, %v1187_v33  ;;  %1676 = vrot.lane.b32.xlu1 %v3040_v15, %s2061_s29  ;;  %v1168_v19 = vpop.permute.xlu0 %1167 }
 0x2ac   : > { %v1175_v21 = vsel %vm344_vm3, %v1166_v32, %v1168_v19 }
 0x2ad   : > { %v1226_v28 = vadd.f32 %v1218_v23, %v1145_v1  ;;  %v1219_v41 = vmul.f32 %v3090_v9, %v1175_v21  ;;  %v1231_v60 = vpop.permute.xlu1 %1230  ;;  %1674 = vrot.lane.b32.xlu0 %v3110_v50, %s2061_s29 }
 0x2ae   : > { %v1258_v29 = vsel %vm418_vm4, 0.0, %v1231_v60 }
 0x2af   : > { %v1227_v22 = vadd.f32 %v1219_v41, %v1146_v42  ;;  %v1262_v20 = vsel %vm2676_vm5, %v1258_v29, 0.0  ;;  %1680 = vrot.lane.b32.xlu1 %v3116_v0, %s2061_s29  ;;  %v1233_v49 = vpop.permute.xlu0 %1232 }
 0x2b0   : > { %v1295_v2 = vmul.f32 %v3100_v6, %v1262_v20  ;;  %v1246_v31 = vsel %vm418_vm4, %v1231_v60, %v1233_v49 }
 0x2b1   : > { %v1263_v9 = vsel %vm2688_vm6, %v1246_v31, 0.0  ;;  %v1239_v27 = vpop.permute.xlu1 %1238  ;;  %1678 = vrot.lane.b32.xlu0 %v3044_v17, %s2061_s29 }
 0x2b2   : > { %v1303_v59 = vadd.f32 %v1295_v2, %v1222_v7  ;;  %v1296_v63 = vmul.f32 %v3100_v6, %v1263_v9  ;;  %v1260_v3 = vsel %vm418_vm4, 0.0, %v1239_v27 }
 0x2b3   : > { %v1266_v26 = vsel %vm2676_vm5, %v1260_v3, 0.0  ;;  %v1241_v32 = vpop.permute.xlu0 %1240 }
 0x2b4   : > { %v1304_v40 = vadd.f32 %v1296_v63, %v1223_v54  ;;  %v1299_v33 = vmul.f32 %v3114_v12, %v1266_v26  ;;  %v1248_v1 = vsel %vm418_vm4, %v1239_v27, %v1241_v32 }
 0x2b5   : > { %v1267_v23 = vsel %vm2688_vm6, %v1248_v1, 0.0  ;;  %v1312_v19 = vpop.permute.xlu1 %1311  ;;  %1682 = vrot.lane.b32.xlu0 %v3122_v5, %s2061_s29  ;;  %s1845_s29 = sshll.u32 %s188_s22, 6 }
 0x2b6   : > { %v1307_v7 = vadd.f32 %v1299_v33, %v1226_v28  ;;  %v1300_v6 = vmul.f32 %v3114_v12, %v1267_v23  ;;  %v1339_v21 = vsel %vm504_vm7, 0.0, %v1312_v19  ;;  %v1418_v23 = vmul.f32 %v3148_v46, %v3036_v30  ;;  %s3542_s7 = scalar_lea.vmem [#allocation2], %s1845_s29 }
 0x2b7   : > { %v1343_v42 = vsel %vm2637_vm2, %v1339_v21, 0.0  ;;  %v1314_v54 = vpop.permute.xlu0 %1313  ;;  %v1421_v30 = vmul.f32 %v3158_v58, %v3040_v15  ;;  %s1779_s12 = sshll.u32 %s3542_s7, 4  ;;  %s3583_s12 = int_to_ptr.vmem [resolvable:$true] %s1779_s12 }
 0x2b8   : > { %v1308_v41 = vadd.f32 %v1300_v6, %v1227_v22  ;;  %v1376_v60 = vmul.f32 %v3128_v48, %v1343_v42  ;;  %v1327_v29 = vsel %vm504_vm7, %v1312_v19, %v1314_v54  ;;  %s1991_s10 = scalar_lea.vmem %s3583_s12, 1024  ;;  %p1998_p0 = scmp.lt.s32.totalorder %s3583_s12, %s1996_s14 }
 0x2b9   : > { %v1344_v20 = vsel %vm2633_vm1, %v1327_v29, 0.0  ;;  %v1320_v49 = vpop.permute.xlu1 %1319  ;;  %p1992_p11 = scmp.ne.s32.totalorder %s3583_s12, %s1991_s10 }
 0x2ba   : > { %v1384_v2 = vadd.f32 %v1376_v60, %v1303_v59  ;;  %v1377_v28 = vmul.f32 %v3128_v48, %v1344_v20  ;;  %v1341_v12 = vsel %vm504_vm7, 0.0, %v1320_v49  ;;  %v1417_v48 = vmul.f32 %v3148_v46, %v3034_v53 }
 0x2bb   : > { %v1347_v31 = vsel %vm2637_vm2, %v1341_v12, 0.0  ;;  %v1322_v9 = vpop.permute.xlu0 %1321  ;;  %v1422_v46 = vmul.f32 %v3158_v58, %v3044_v17  ;;  %p1993_p12 = pnand %p1992_p11, %p2128_p5 }
 0x2bc   : > { %v1385_v27 = vadd.f32 %v1377_v28, %v1304_v40  ;;  %v1380_v22 = vmul.f32 %v3138_v18, %v1347_v31  ;;  %v1329_v63 = vsel %vm504_vm7, %v1320_v49, %v1322_v9 }
 0x2bd   : > { %v1348_v3 = vsel %vm2633_vm1, %v1329_v63, 0.0  ;;  %v1434_v26 = vpop.permute.xlu1 %1433  ;;  %p1994_p13 = pneg %p1993_p12 }
 0x2be   : > { %v1388_v32 = vadd.f32 %v1380_v22, %v1307_v7  ;;  %v1381_v59 = vmul.f32 %v3138_v18, %v1348_v3  ;;  %v1425_v18 = vadd.f32 %v1417_v48, %v1384_v2  ;;  %v1426_v42 = vadd.f32 %v1418_v23, %v1385_v27 }
 0x2bf   : > { %v1436_v33 = vpop.permute.xlu0 %1435 }
 0x2c0   : > { %v1389_v1 = vadd.f32 %v1381_v59, %v1308_v41  ;;  %v1449_v40 = vsel %vm627_vm9, %v1434_v26, %v1436_v33  ;;  %v1461_v19 = vsel %vm627_vm9, %v1436_v33, 0.0  ;;  %v1429_v12 = vadd.f32 %v1421_v30, %v1388_v32 }
 0x2c1   : > { %v1465_v6 = vsel %vm2676_vm5, %v1449_v40, 0.0  ;;  %v1466_v7 = vsel %vm2688_vm6, %v1461_v19, 0.0  ;;  %v1442_v21 = vpop.permute.xlu1 %1441 }
 0x2c2   : > { %v1498_v53 = vmul.f32 %v3168_v57, %v1465_v6  ;;  %v1499_v54 = vmul.f32 %v3168_v57, %v1466_v7  ;;  %v1430_v31 = vadd.f32 %v1422_v46, %v1389_v1 }
 0x2c3   : > { %v1444_v41 = vpop.permute.xlu0 %1443 }
 0x2c4   : > { %v1506_v60 = vadd.f32 %v1498_v53, %v1425_v18  ;;  %v1507_v29 = vadd.f32 %v1499_v54, %v1426_v42  ;;  %v1451_v20 = vsel %vm627_vm9, %v1442_v21, %v1444_v41  ;;  %v1463_v49 = vsel %vm627_vm9, %v1444_v41, 0.0 }
 0x2c5   : > { %v1469_v2 = vsel %vm2676_vm5, %v1451_v20, 0.0  ;;  %v1470_v28 = vsel %vm2688_vm6, %v1463_v49, 0.0  ;;  %v1515_v57 = vpop.permute.xlu1 %1514 }
 0x2c6   : > { %v1502_v15 = vmul.f32 %v3178_v51, %v1469_v2  ;;  %v1503_v17 = vmul.f32 %v3178_v51, %v1470_v28 }
 0x2c7   : > { %v1517_v58 = vpop.permute.xlu0 %1516 }
 0x2c8   : > { %v1510_v9 = vadd.f32 %v1502_v15, %v1429_v12  ;;  %v1511_v27 = vadd.f32 %v1503_v17, %v1430_v31  ;;  %v1530_v22 = vsel %vm709_vm8, %v1515_v57, %v1517_v58  ;;  %v1542_v63 = vsel %vm709_vm8, %v1517_v58, 0.0 }
 0x2c9   : > { %v1546_v3 = vsel %vm2637_vm2, %v1530_v22, 0.0  ;;  %v1547_v26 = vsel %vm2633_vm1, %v1542_v63, 0.0  ;;  %v1523_v59 = vpop.permute.xlu1 %1522 }
 0x2ca   : > { %v1579_v32 = vmul.f32 %v3188_v13, %v1546_v3  ;;  %v1580_v48 = vmul.f32 %v3188_v13, %v1547_v26 }
 0x2cb   : > { %v1525_v33 = vpop.permute.xlu0 %1524 }
 0x2cc   : > { %v3343_v51 = vadd.f32 %v1579_v32, %v1506_v60  ;;  %v3345_v1 = vadd.f32 %v1580_v48, %v1507_v29  ;;  %v1532_v23 = vsel %vm709_vm8, %v1523_v59, %v1525_v33  ;;  %v1544_v40 = vsel %vm709_vm8, %v1525_v33, 0.0 }
 0x2cd   : > { %v1550_v19 = vsel %vm2637_vm2, %v1532_v23, 0.0  ;;  %v1551_v6 = vsel %vm2633_vm1, %v1544_v40, 0.0  ;;  %v1082_v7 = vpop.permute.xlu1 %1081 }
 0x2ce   : > { %v1583_v21 = vmul.f32 %v3205_v62, %v1550_v19  ;;  %v1584_v13 = vmul.f32 %v3205_v62, %v1551_v6  ;;  %v1106_v59 = vsel %vm259_vm0, 0.0, %v1082_v7 }
 0x2cf   : > { %v1084_v18 = vpop.permute.xlu0 %1083  ;;  %v1111_v23 = vsel %vm2637_vm2, %v1106_v59, 0.0 }
 0x2d0   : > { %v3355_v42 = vadd.f32 %v1583_v21, %v1510_v9  ;;  %v3357_v53 = vadd.f32 %v1584_v13, %v1511_v27  ;;  %v1094_v32 = vsel %vm259_vm0, %v1082_v7, %v1084_v18  ;;  %v1143_v7 = vmul.f32 %v3074_v16, %v1111_v23 }
 0x2d1   : > { %v1090_v54 = vpop.permute.xlu1 %1089  ;;  %v1112_v40 = vsel %vm2633_vm1, %v1094_v32, 0.0 }
 0x2d2   : > { %3730 = vst [vmem:[#allocation30_spill] sm:$0xff] %v3355_v42  ;;  %3731 = vst [vmem:[#allocation29_spill] sm:$0xff] %v3357_v53  ;;  %v1108_v19 = vsel %vm259_vm0, 0.0, %v1090_v54  ;;  %v1144_v18 = vmul.f32 %v3074_v16, %v1112_v40 }
 0x2d3   : > { %v1092_v30 = vpop.permute.xlu0 %1091  ;;  %v1115_v32 = vsel %vm2637_vm2, %v1108_v19, 0.0 }
 0x2d4   : > { %v1096_v46 = vsel %vm259_vm0, %v1090_v54, %v1092_v30 }
 0x2d5   : > { %v1162_v41 = vpop.permute.xlu1 %1161  ;;  %v1116_v54 = vsel %vm2633_vm1, %v1096_v46, 0.0 }
 0x2d6   : > { %v1186_v21 = vsel %vm344_vm3, 0.0, %v1162_v41 }
 0x2d7   : > { %v1164_v60 = vpop.permute.xlu0 %1163 }
 0x2d8   : > { %v1174_v13 = vsel %vm344_vm3, %v1162_v41, %v1164_v60  ;;  %v1216_v60 = vmul.f32 %v3094_v47, %v1186_v21 }
 0x2d9   : > { %v1170_v29 = vpop.permute.xlu1 %1169  ;;  %v1217_v16 = vmul.f32 %v3094_v47, %v1174_v13  ;;  %v1147_v13 = vmul.f32 %v3084_v37, %v1115_v32 }
 0x2da   : > { %v1188_v23 = vsel %vm344_vm3, 0.0, %v1170_v29 }
 0x2db   : > { %v1172_v20 = vpop.permute.xlu0 %1171 }
 0x2dd   : > { %v1235_v49 = vpop.permute.xlu1 %1234 }
 0x2de   : > { %v1259_v30 = vsel %vm418_vm4, 0.0, %v1235_v49 }
 0x2df   : > { %v1237_v2 = vpop.permute.xlu0 %1236  ;;  %v1264_v40 = vsel %vm2676_vm5, %v1259_v30, 0.0  ;;  %v1220_v30 = vmul.f32 %v3104_v34, %v1188_v23  ;;  %v1225_v23 = vadd.f32 %v1217_v16, %v1144_v18 }
 0x2e1   : > { %v1243_v28 = vpop.permute.xlu1 %1242 }
 0x2e3   : > { %v1245_v57 = vpop.permute.xlu0 %1244 }
 0x2e4   : > { %v1249_v41 = vsel %vm418_vm4, %v1243_v28, %v1245_v57 }
 0x2e5   : > { %v1316_v12 = vpop.permute.xlu1 %1315  ;;  %v1269_v47 = vsel %vm2688_vm6, %v1249_v41, 0.0 }
 0x2e6   : > { %v1340_v19 = vsel %vm504_vm7, 0.0, %v1316_v12  ;;  %v1302_v32 = vmul.f32 %v3132_v8, %v1269_v47 }
 0x2e7   : > { %v1318_v31 = vpop.permute.xlu0 %1317  ;;  %v1345_v41 = vsel %vm2637_vm2, %v1340_v19, 0.0 }
 0x2e9   : > { %v1324_v62 = vpop.permute.xlu1 %1323 }
 0x2eb   : > { %v1326_v15 = vpop.permute.xlu0 %1325 }
 0x2ed   : > { %v3360_v17 = vpop.permute.xlu1 %1437 }
 0x2ef   : > { %v3362_v58 = vpop.permute.xlu0 %1439 }
 0x2f0   : > { %v1462_v18 = vsel %vm627_vm9, %v3362_v58, 0.0 }
 0x2f1   : > { %v3364_v9 = vpop.permute.xlu1 %1445 }
 0x2f3   : > { %v3366_v27 = vpop.permute.xlu0 %1447 }
 0x2f5   : > { %v3368_v22 = vpop.permute.xlu1 %1518 }
 0x2f7   : > { %v3370_v63 = vpop.permute.xlu0 %1520 }
 0x2f9   : > { %v3372_v3 = vpop.permute.xlu1 %1526 }
 0x2fb   : > { %v3374_v26 = vpop.permute.xlu0 %1528 }
 0x306   : > { %v3378_v48 = vpop.permute.xlu1 %1715 }
 0x308   : > { %v3380_v33 = vpop.permute.xlu0 %1649 }
 0x309   : > { %3732 = vst [vmem:[#allocation11_spill] sm:$0xff] %v3380_v33  ;;  %v1247_v33 = vsel %vm418_vm4, %v1235_v49, %v1237_v2  ;;  %v1176_v49 = vsel %vm344_vm3, %v1170_v29, %v1172_v20  ;;  %v1342_v29 = vsel %vm504_vm7, 0.0, %v1324_v62  ;;  %v1330_v20 = vsel %vm504_vm7, %v1324_v62, %v1326_v15 }
 0x30a   : > { %v3387_v6 = vpop.permute.xlu1 %1725  ;;  %v1265_v46 = vsel %vm2688_vm6, %v1247_v33, 0.0  ;;  %v1148_v33 = vmul.f32 %v3084_v37, %v1116_v54  ;;  %v1349_v37 = vsel %vm2637_vm2, %v1342_v29, 0.0  ;;  %v1224_v54 = vadd.f32 %v1216_v60, %v1143_v7 }
 0x30b   : > { %3733 = vst [vmem:[#allocation12_spill] sm:$0xff] %v3387_v6  ;;  %v1261_v6 = vsel %vm418_vm4, 0.0, %v1243_v28  ;;  %v1328_v28 = vsel %vm504_vm7, %v1316_v12, %v1318_v31  ;;  %v1221_v12 = vmul.f32 %v3104_v34, %v1176_v49  ;;  %v1297_v31 = vmul.f32 %v3120_v45, %v1264_v40 }
 0x30c   : > { %v3395_v59 = vpop.permute.xlu0 %1720  ;;  %v1268_v57 = vsel %vm2676_vm5, %v1261_v6, 0.0  ;;  %v1298_v6 = vmul.f32 %v3120_v45, %v1265_v46  ;;  %v1346_v62 = vsel %vm2633_vm1, %v1328_v28, 0.0  ;;  %v1350_v34 = vsel %vm2633_vm1, %v1330_v20, 0.0 }
 0x30d   : > { %v1228_v49 = vadd.f32 %v1220_v30, %v1147_v13  ;;  %v1229_v40 = vadd.f32 %v1221_v12, %v1148_v33  ;;  %v1378_v46 = vmul.f32 %v3142_v10, %v1345_v41  ;;  %v1379_v19 = vmul.f32 %v3142_v10, %v1346_v62 }
 0x30e   : > { %v3407_v2 = vpop.permute.xlu1 %1595  ;;  %v1382_v28 = vmul.f32 %v3152_v35, %v1349_v37  ;;  %v1305_v47 = vadd.f32 %v1297_v31, %v1224_v54  ;;  %v1306_v53 = vadd.f32 %v1298_v6, %v1225_v23  ;;  %v1450_v7 = vsel %vm627_vm9, %v3360_v17, %v3362_v58 }
 0x30f   : > { %v1310_v42 = vadd.f32 %v1302_v32, %v1229_v40  ;;  %v1452_v10 = vsel %vm627_vm9, %v3364_v9, %v3366_v27  ;;  %v1464_v60 = vsel %vm627_vm9, %v3366_v27, 0.0  ;;  %v1531_v33 = vsel %vm709_vm8, %v3368_v22, %v3370_v63 }
 0x310   : > { %v3421_v21 = vpop.permute.xlu0 %1730  ;;  %v1386_v16 = vadd.f32 %v1378_v46, %v1305_v47  ;;  %v1387_v20 = vadd.f32 %v1379_v19, %v1306_v53  ;;  %v1543_v17 = vsel %vm709_vm8, %v3370_v63, 0.0  ;;  %v1467_v9 = vsel %vm2676_vm5, %v1450_v7, 0.0 }
 0x311   : > { %3734 = vst [vmem:[#allocation14_spill] sm:$0xff] %v3421_v21  ;;  %v1301_v21 = vmul.f32 %v3132_v8, %v1268_v57  ;;  %v1383_v57 = vmul.f32 %v3152_v35, %v1350_v34  ;;  %v1468_v27 = vsel %vm2688_vm6, %v1462_v18, 0.0  ;;  %v1471_v53 = vsel %vm2676_vm5, %v1452_v10, 0.0 }
 0x312   : > { %v1600_v15 = vpop.permute.xlu1 %1599  ;;  %v1419_v22 = vmul.f32 %v3162_v14, %v3106_v24  ;;  %v1423_v63 = vmul.f32 %v3172_v38, %v3116_v0  ;;  %v1420_v12 = vmul.f32 %v3162_v14, %v3110_v50  ;;  %v1424_v31 = vmul.f32 %v3172_v38, %v3122_v5 }
 0x313   : > { %v1309_v29 = vadd.f32 %v1301_v21, %v1228_v49  ;;  %v1391_v21 = vadd.f32 %v1383_v57, %v1310_v42  ;;  %v1472_v42 = vsel %vm2688_vm6, %v1464_v60, 0.0  ;;  %v1548_v6 = vsel %vm2637_vm2, %v1531_v33, 0.0 }
 0x314   : > { %v1598_v45 = vpop.permute.xlu0 %1597  ;;  %v1549_v41 = vsel %vm2633_vm1, %v1543_v17, 0.0  ;;  %v1500_v62 = vmul.f32 %v3182_v25, %v1467_v9  ;;  %v1501_v24 = vmul.f32 %v3182_v25, %v1468_v27  ;;  %v1504_v32 = vmul.f32 %v3195_v61, %v1471_v53 }
 0x315   : > { %v1390_v13 = vadd.f32 %v1382_v28, %v1309_v29  ;;  %v1505_v0 = vmul.f32 %v3195_v61, %v1472_v42  ;;  %v1427_v34 = vadd.f32 %v1419_v22, %v1386_v16  ;;  %v1428_v50 = vadd.f32 %v1420_v12, %v1387_v20 }
 0x316   : > { %v1604_v8 = vpop.permute.xlu1 %1603  ;;  %v1432_v54 = vadd.f32 %v1424_v31, %v1391_v21  ;;  %v1581_v5 = vmul.f32 %v3210_v39, %v1548_v6  ;;  %v1582_v38 = vmul.f32 %v3210_v39, %v1549_v41  ;;  %v1611_v23 = vsel %vm791_vm10, %v3407_v2, %v1598_v45  ;;  %v1984_v41 = vld [vmem:[%s2143_s5 + $0x8] sm:$0xff] }
 0x317   : > { %v1431_v14 = vadd.f32 %v1423_v63, %v1390_v13  ;;  %v1623_v49 = vsel %vm791_vm10, %v1598_v45, 0.0  ;;  %v1508_v46 = vadd.f32 %v1500_v62, %v1427_v34  ;;  %v1509_v19 = vadd.f32 %v1501_v24, %v1428_v50  ;;  %v3736_v50 = vld [vmem:[#allocation29_spill] sm:$0xff] }
 0x318   : > { %v1602_v35 = vpop.permute.xlu0 %1601  ;;  %v3493_v57 = vadd.f32 %v1505_v0, %v1432_v54  ;;  %v1533_v39 = vsel %vm709_vm8, %v3372_v3, %v3374_v26  ;;  %v1545_v2 = vsel %vm709_vm8, %v3374_v26, 0.0  ;;  %v1652_v45 = vmul.f32 %v3215_v52, %v1611_v23 }
 0x319   : > { %v1612_v25 = vsel %vm791_vm10, %v1600_v15, %v1602_v35  ;;  %v1624_v61 = vsel %vm791_vm10, %v1602_v35, 0.0  ;;  %v3491_v28 = vadd.f32 %v1504_v32, %v1431_v14  ;;  %v1653_v15 = vmul.f32 %v3215_v52, %v1623_v49 }
 0x31a   : > { %v3458_v58 = vpop.permute.xlu1 %1607  ;;  %v1589_v47 = vadd.f32 %v1581_v5, %v1508_v46  ;;  %v1590_v29 = vadd.f32 %v1582_v38, %v1509_v19  ;;  %v1654_v7 = vmul.f32 %v3227_v56, %v1612_v25  ;;  %v1655_v18 = vmul.f32 %v3227_v56, %v1624_v61  ;;  %v1985_v46 = vld [vmem:[%s2143_s5 + $0x10] sm:$0xff] }
 0x31b   : > { %v1552_v52 = vsel %vm2637_vm2, %v1533_v39, 0.0  ;;  %v1553_v20 = vsel %vm2633_vm1, %v1545_v2, 0.0  ;;  %v1661_v21 = vadd.f32 %v1653_v15, %v3345_v1  ;;  %v1986_v39 = vld [vmem:[%s2143_s5 + $0x18] sm:$0xff] }
 0x31c   : > { %v1606_v30 = vpop.permute.xlu0 %1605  ;;  %v1662_v17 = vadd.f32 %v1654_v7, %v1589_v47  ;;  %v1663_v44 = vadd.f32 %v1655_v18, %v1590_v29  ;;  %v1585_v0 = vmul.f32 %v3219_v11, %v1552_v52 }
 0x31d   : > { %v1613_v35 = vsel %vm791_vm10, %v1604_v8, %v1606_v30  ;;  %v1625_v3 = vsel %vm791_vm10, %v1606_v30, 0.0  ;;  %v1660_v8 = vadd.f32 %v1652_v45, %v3343_v51  ;;  %v3738_v45 = vld [vmem:[#allocation12_spill] sm:$0xff] }
 0x31e   : > { %v1669_v37 = vpop.permute.xlu1 %1668  ;;  %v1656_v9 = vmul.f32 %v3223_v55, %v1613_v35  ;;  %v1657_v27 = vmul.f32 %v3223_v55, %v1625_v3  ;;  %v1983_v55 = vld [vmem:[%s2143_s5] sm:$0xff]  ;;  %v1593_v29 = vadd.f32 %v1585_v0, %v3491_v28 }
 0x320   : > { %v1610_v40 = vpop.permute.xlu0 %1609  ;;  %v1665_v14 = vadd.f32 %v1657_v27, %v3736_v50 }
 0x321   : > { %v1614_v63 = vsel %vm791_vm10, %v3458_v58, %v1610_v40  ;;  %v1626_v30 = vsel %vm791_vm10, %v1610_v40, 0.0  ;;  %v1586_v58 = vmul.f32 %v3219_v11, %v1553_v20  ;;  %v3737_v11 = vld [vmem:[#allocation11_spill] sm:$0xff]  ;;  %v1987_v20 = vld [vmem:[%s2143_s5 + $0x20] sm:$0xff] }
 0x322   : > { %v1673_v10 = vpop.permute.xlu1 %1672  ;;  %v1658_v49 = vmul.f32 %v3737_v11, %v1614_v63  ;;  %v1659_v40 = vmul.f32 %v3737_v11, %v1626_v30 }
 0x323   : > { %v1594_v7 = vadd.f32 %v1586_v58, %v3493_v57 }
 0x324   : > { %v1671_v60 = vpop.permute.xlu0 %1670 }
 0x325   : > { %v1684_v26 = vsel %vm865_vm11, %v1669_v37, %v1671_v60  ;;  %v1696_v16 = vsel %vm865_vm11, %v1671_v60, 0.0  ;;  %v3735_v37 = vld [vmem:[#allocation30_spill] sm:$0xff]  ;;  %v1667_v52 = vadd.f32 %v1659_v40, %v1594_v7 }
 0x326   : > { %v1700_v56 = vsel %vm2676_vm5, %v1684_v26, 0.0  ;;  %v1701_v13 = vsel %vm2688_vm6, %v1696_v16, 0.0  ;;  %v1664_v34 = vadd.f32 %v1656_v9, %v3735_v37  ;;  %v1666_v16 = vadd.f32 %v1658_v49, %v1593_v29  ;;  %v1990_v9 = vld [vmem:[%s2143_s5 + $0x38] sm:$0xff] }
 0x327   : > { %v1733_v33 = vmul.f32 %v3378_v48, %v1700_v56  ;;  %v1734_v4 = vmul.f32 %v3378_v48, %v1701_v13  ;;  %v1677_v48 = vpop.permute.xlu1 %1676  ;;  %v1988_v13 = vld [vmem:[%s2143_s5 + $0x28] sm:$0xff] }
 0x328   : > { %v1675_v53 = vpop.permute.xlu0 %1674 }
 0x329   : > { %v1741_v42 = vadd.f32 %v1733_v33, %v1660_v8  ;;  %v1742_v22 = vadd.f32 %v1734_v4, %v1661_v21  ;;  %v1685_v51 = vsel %vm865_vm11, %v1673_v10, %v1675_v53  ;;  %v1697_v1 = vsel %vm865_vm11, %v1675_v53, 0.0  ;;  %v3739_v21 = vld [vmem:[#allocation14_spill] sm:$0xff] }
 0x32a   : > { %v1702_v12 = vsel %vm2676_vm5, %v1685_v51, 0.0  ;;  %v1703_v31 = vsel %vm2688_vm6, %v1697_v1, 0.0 }
 0x32b   : > { %v1749_v6 = vadd.f32 %v1983_v55, %v1741_v42  ;;  %v1750_v62 = vadd.f32 %v1984_v41, %v1742_v22  ;;  %v1735_v24 = vmul.f32 %v3395_v59, %v1702_v12  ;;  %v1736_v32 = vmul.f32 %v3395_v59, %v1703_v31  ;;  %v1681_v18 = vpop.permute.xlu1 %1680 }
 0x32c   : > { %v1679_v54 = vpop.permute.xlu0 %1678 }
 0x32d   : > { %1757 = vst [vmem:[%s3542_s7] sm:$0xff] %v1749_v6  ;;  %1758 = vst [vmem:[%s3542_s7 + $0x8] sm:$0xff] %v1750_v62  ;;  %v1743_v5 = vadd.f32 %v1735_v24, %v1662_v17  ;;  %v1744_v38 = vadd.f32 %v1736_v32, %v1663_v44  ;;  %v1686_v59 = vsel %vm865_vm11, %v1677_v48, %v1679_v54  ;;  %v1698_v23 = vsel %vm865_vm11, %v1679_v54, 0.0  ;;  %v1989_v17 = vld [vmem:[%s2143_s5 + $0x30] sm:$0xff]  ;;  %s1997_s5 = scalar_lea.vmem %s1996_s14, 2048 }
 0x32e   : > { %v1704_v25 = vsel %vm2676_vm5, %v1686_v59, 0.0  ;;  %v1705_v61 = vsel %vm2688_vm6, %v1698_v23, 0.0  ;;  %p1999_p1 = scmp.lt.s32.totalorder %s1997_s5, %s1991_s10 }
 0x32f   : > { %v1751_v19 = vadd.f32 %v1985_v46, %v1743_v5  ;;  %v1752_v2 = vadd.f32 %v1986_v39, %v1744_v38  ;;  %v1737_v15 = vmul.f32 %v3738_v45, %v1704_v25  ;;  %v1738_v47 = vmul.f32 %v3738_v45, %v1705_v61 }
 0x330   : > { %v1683_v10 = vpop.permute.xlu0 %1682  ;;  %p2000_p2 = por %p1999_p1, %p1998_p0 }
 0x331   : > { %1759 = vst [vmem:[%s3542_s7 + $0x10] sm:$0xff] %v1751_v19  ;;  %1760 = vst [vmem:[%s3542_s7 + $0x18] sm:$0xff] %v1752_v2  ;;  %v1745_v60 = vadd.f32 %v1737_v15, %v1664_v34  ;;  %v1746_v35 = vadd.f32 %v1738_v47, %v1665_v14  ;;  %v1687_v3 = vsel %vm865_vm11, %v1681_v18, %v1683_v10  ;;  %v1699_v26 = vsel %vm865_vm11, %v1683_v10, 0.0 }
 0x332   : > { %v1706_v28 = vsel %vm2676_vm5, %v1687_v3, 0.0  ;;  %v1707_v57 = vsel %vm2688_vm6, %v1699_v26, 0.0  ;;  %p2001_p3 = pnand %p2000_p2, %p1994_p13 }
 0x333   : > { %v1753_v56 = vadd.f32 %v1987_v20, %v1745_v60  ;;  %v1754_v8 = vadd.f32 %v1988_v13, %v1746_v35  ;;  %v1739_v33 = vmul.f32 %v3739_v21, %v1706_v28  ;;  %v1740_v4 = vmul.f32 %v3739_v21, %v1707_v57 }
 0x335   : > { %1761 = vst [vmem:[%s3542_s7 + $0x20] sm:$0xff] %v1753_v56  ;;  %1762 = vst [vmem:[%s3542_s7 + $0x28] sm:$0xff] %v1754_v8  ;;  %v1747_v43 = vadd.f32 %v1739_v33, %v1666_v16  ;;  %v1748_v36 = vadd.f32 %v1740_v4, %v1667_v52 }
 0x337   : > { %v1755_v44 = vadd.f32 %v1989_v17, %v1747_v43  ;;  %v1756_v27 = vadd.f32 %v1990_v9, %v1748_v36 }
 0x339   : > { %1763 = vst [vmem:[%s3542_s7 + $0x30] sm:$0xff] %v1755_v44  ;;  %1764 = vst [vmem:[%s3542_s7 + $0x38] sm:$0xff] %v1756_v27 }
 0x33a   : > { %2004 = shalt.err (!%p2001_p3)
}
 0x33b   : > { %s2005_s23 = scalar_lea.hbm %s3579_s28, 1024  ;;  %s2009_s30 = scalar_lea.hbm %s3634_s4, 2048 }
 0x33c   : > { %p2006_p4 = scmp.ne.s32.totalorder %s3579_s28, %s2005_s23  ;;  %p2010_p9 = scmp.lt.s32.totalorder %s3579_s28, %s3634_s4 }
 0x33d   : > { %p2011_p10 = scmp.lt.s32.totalorder %s2009_s30, %s2005_s23 }
 0x33e   : > { %p2007_p7 = pnand %p2006_p4, %p2128_p5 }
 0x33f   : > { %p2012_p11 = por %p2011_p10, %p2010_p9 }
 0x340   : > { %p2008_p8 = pneg %p2007_p7 }
 0x342   : > { %p2013_p12 = pnand %p2012_p11, %p2008_p8 }
 0x344   : > { %2016 = shalt.err (!%p2013_p12)
}
 0x345   : > { %s2064_s7 = smov 256  }
 0x346   : > { %1931 = dma.vmem_to_hbm [thread:$0]  (%p2128_p5), %s3583_s12, 1024, %s3579_s28, %s3589_s19, %s2064_s7, %s2064_s7, %s2055_s20  }
 0x347 PF: > { %p1937_p13 = scmp.ge.s32.totalorder %s2051_s18, 2  ;;  %s1794_s11 = sand.u32 1, %s2039_s15  }
 0x348   : > { %s1795_s6 = scalar_lea.sflag [#allocation3], %s1794_s11 }
 0x349   : > { %p1934_p0 = pnand %p1937_p13, %p2132_p6 }
 0x34b   : > { %p1935_p1 = pneg %p1934_p0 }
 0x34d   : > { %2034 = dma.done.wait (%p1935_p1), %s1795_s6, 1024  }
 0x34e   : > { %2036 = vsyncadd (%p1935_p1), %s1795_s6, 4294966272  ;;  %p14_p2 = scmp.ge.s32.totalorder %s2115_s21, 4   ;;  %s3740_s15 = smov %s2043_s16 }
 0x34f   : > { %s3741_s16 = smov %s2047_s17  ;;  %s3742_s17 = smov %s2126_s24 }
 0x350   : > { %s3743_s18 = smov %s2115_s21  ;;  %16 = sbr.rel (!%p14_p2) target bundleno = 3 (0x3), region = 87 }
 0x355   :  { %1800 = vsyncpa [#allocation3], 1 }
 0x356   :  { %1802 = vsyncpa [#allocation3 + $0x1], 1 }

</bundles_post_ra>
